<compile_context>
chip_gen: v7x
topology: tpu7x:2x2x1
jax: 0.10.0
libtpu: 0.0.40
codegen_flags: <defaults>
</compile_context>

<pallas_src>
import jax
import jax.numpy as jnp
from jax.experimental import pallas as pl
from jax.experimental.pallas import tpu as pltpu

C = 144                                       # channels (= depthwise groups)
H_IN = W_IN = 28
K = 5                                         # kernel size
STRIDE = 2
PAD = 2
H_OUT = (H_IN + 2 * PAD - K) // STRIDE + 1    # 14
W_OUT = (W_IN + 2 * PAD - K) // STRIDE + 1    # 14
H_PAD = H_IN + 2 * PAD                        # 32
WP = (W_IN + 2 * PAD) // 2                    # 16  (width of each W-parity phase)
ROWS = 2                                      # output rows per grid step
assert H_OUT % ROWS == 0


def _dwconv_kernel(xe_ref, xo_ref, w_ref, o_ref):
    # xe_ref, xo_ref: (H_PAD, WP, C) even / odd W-parity phases of the padded
    #                 input, resident in VMEM across all grid steps.
    # w_ref:          (K, K, C) depthwise filter.
    # o_ref:          (ROWS, W_OUT, C) output block for rows [ROWS*i, ROWS*i+ROWS).
    r_base = pl.program_id(0) * ROWS
    w_all = w_ref[...]                         # (K, K, C): ~10 vregs, loaded once per step
    phases = (xe_ref, xo_ref)                  # indexed by kw parity (static)

    for r in range(ROWS):                      # static unroll; small per-row accumulator
        oh = r_base + r
        acc = jnp.zeros((W_OUT, C), jnp.float32)
        for kh in range(K):
            h = 2 * oh + kh                    # dynamic index on the leading (non-layout) axis
            for kw in range(K):
                xr = phases[kw % 2]
                w0 = kw // 2                   # static sublane offset inside the phase
                # output(oh, ow, c) needs x_pad[2*oh+kh, 2*ow+kw, c]
                #   = phase[kw%2][2*oh+kh, ow + kw//2, c]
                patch = xr[h, pl.ds(w0, W_OUT), :]           # (W_OUT, C) contiguous load
                acc = acc + patch * w_all[kh, kw][None, :]
        o_ref[r] = acc


def depthwise_conv2d(x_nchw, w_oihw):
    """x_nchw: (1, 144, 28, 28) f32, w_oihw: (144, 1, 5, 5) f32 -> (1, 144, 14, 14)."""
    assert x_nchw.shape == (1, C, H_IN, W_IN)
    assert w_oihw.shape == (C, 1, K, K)

    # NCHW -> HWC (batch = 1), channels on lanes.
    x_hwc = jnp.transpose(x_nchw[0], (1, 2, 0)).astype(jnp.float32)      # (28, 28, 144)

    # Fused "zero-pad + stride-2 W-phase split" (no full x_pad materialized):
    #   xe[:, j, :] == x_pad[:, 2*j,     :]
    #   xo[:, j, :] == x_pad[:, 2*j + 1, :]
    xe = jnp.pad(x_hwc[:, 0::2, :], ((PAD, PAD), (1, 1), (0, 0)))        # (32, 16, 144)
    xo = jnp.pad(x_hwc[:, 1::2, :], ((PAD, PAD), (1, 1), (0, 0)))        # (32, 16, 144)

    # (Cout=144, 1, 5, 5) -> (5, 5, 144), channels on lanes.
    w_hwc = jnp.transpose(w_oihw[:, 0, :, :], (1, 2, 0)).astype(jnp.float32)

    resident = lambda shape: pl.BlockSpec(shape, lambda i: (0, 0, 0))
    out = pl.pallas_call(
        _dwconv_kernel,
        out_shape=jax.ShapeDtypeStruct((H_OUT, W_OUT, C), jnp.float32),
        grid_spec=pltpu.PrefetchScalarGridSpec(
            num_scalar_prefetch=0,
            grid=(H_OUT // ROWS,),                     # 7 output-row blocks
            in_specs=[
                resident((H_PAD, WP, C)),              # xe (constant block -> DMA'd once)
                resident((H_PAD, WP, C)),              # xo
                resident((K, K, C)),                   # weights
            ],
            out_specs=pl.BlockSpec((ROWS, W_OUT, C), lambda i: (i, 0, 0)),
        ),
        compiler_params=pltpu.CompilerParams(
            dimension_semantics=("parallel",)),        # 2-TC split on v7x
    )(xe, xo, w_hwc)                                    # (14, 14, 144)

    # HWC -> NCHW
    return jnp.transpose(out, (2, 0, 1))[None]          # (1, 144, 14, 14)


if __name__ == "__main__":
    key = jax.random.PRNGKey(0)
    kx, kw = jax.random.split(key)
    x63 = jax.random.normal(kx, (1, C, H_IN, W_IN), dtype=jnp.float32)
    weight = jax.random.normal(kw, (C, 1, K, K), dtype=jnp.float32) * 0.1

    y = depthwise_conv2d(x63, weight)
    y = jax.block_until_ready(y)
    assert y.shape == (1, C, H_OUT, W_OUT), y.shape

    # Reference check against XLA's grouped conv (same semantics as the
    # PyTorch Conv2d with groups=144, stride=2, padding=2, no bias).
    y_ref = jax.lax.conv_general_dilated(
        x63, weight,
        window_strides=(STRIDE, STRIDE),
        padding=((PAD, PAD), (PAD, PAD)),
        dimension_numbers=("NCHW", "OIHW", "NCHW"),
        feature_group_count=C,
    )
    y_ref = jax.block_until_ready(y_ref)
    assert jnp.allclose(y, y_ref, atol=1e-4, rtol=1e-4), float(
        jnp.max(jnp.abs(y - y_ref)))

    print("KERNEL_OK")
</pallas_src>

<mosaic_0001>
module attributes {stable_mosaic.version = 11 : i64} {
  func.func @_dwconv_kernel(%arg0: i32, %arg1: memref<32x16x144xf32, #tpu.memory_space<vmem>>, %arg2: memref<32x16x144xf32, #tpu.memory_space<vmem>>, %arg3: memref<5x5x144xf32, #tpu.memory_space<vmem>>, %arg4: memref<2x14x144xf32, #tpu.memory_space<vmem>>) attributes {dimension_semantics = [#tpu.dimension_semantics<parallel>], iteration_bounds = array<i64: 7>, scalar_prefetch = 0 : i64, scratch_operands = 0 : i64, tpu.core_type = #tpu.core_type<tc>, window_params = [{pipeline_mode = #tpu.pipeline_mode<synchronous>, transform_indices = @transform_0, window_bounds = array<i64: 32, 16, 144>}, {pipeline_mode = #tpu.pipeline_mode<synchronous>, transform_indices = @transform_1, window_bounds = array<i64: 32, 16, 144>}, {pipeline_mode = #tpu.pipeline_mode<synchronous>, transform_indices = @transform_2, window_bounds = array<i64: 5, 5, 144>}, {transform_indices = @transform_3, window_bounds = array<i64: 2, 14, 144>}]} {
    %c2_i32 = arith.constant 2 : i32
    %0 = arith.muli %arg0, %c2_i32 : i32
    %c0 = arith.constant 0 : index
    %c0_0 = arith.constant 0 : index
    %c0_1 = arith.constant 0 : index
    %1 = vector.load %arg3[%c0, %c0_0, %c0_1] : memref<5x5x144xf32, #tpu.memory_space<vmem>>, vector<5x5x144xf32>
    %c0_i32 = arith.constant 0 : i32
    %2 = arith.addi %0, %c0_i32 : i32
    %cst = arith.constant 0.000000e+00 : f32
    %3 = vector.broadcast %cst : f32 to vector<14x144xf32>
    %c2_i32_2 = arith.constant 2 : i32
    %4 = arith.muli %c2_i32_2, %2 : i32
    %c0_i32_3 = arith.constant 0 : i32
    %5 = arith.addi %4, %c0_i32_3 : i32
    %6 = arith.index_cast %5 : i32 to index
    %c0_4 = arith.constant 0 : index
    %c0_5 = arith.constant 0 : index
    %7 = vector.load %arg1[%6, %c0_4, %c0_5] : memref<32x16x144xf32, #tpu.memory_space<vmem>>, vector<1x14x144xf32>
    %8 = vector.shape_cast %7 : vector<1x14x144xf32> to vector<14x144xf32>
    %9 = vector.extract_strided_slice %1 {offsets = [0, 0, 0], sizes = [1, 1, 144], strides = [1, 1, 1]} : vector<5x5x144xf32> to vector<1x1x144xf32>
    %10 = vector.shape_cast %9 : vector<1x1x144xf32> to vector<144xf32>
    %11 = vector.shape_cast %10 : vector<144xf32> to vector<1x144xf32>
    %12 = vector.broadcast %11 : vector<1x144xf32> to vector<14x144xf32>
    %13 = arith.mulf %8, %12 : vector<14x144xf32>
    %14 = arith.addf %3, %13 : vector<14x144xf32>
    %15 = arith.index_cast %5 : i32 to index
    %c0_6 = arith.constant 0 : index
    %c0_7 = arith.constant 0 : index
    %16 = vector.load %arg2[%15, %c0_6, %c0_7] : memref<32x16x144xf32, #tpu.memory_space<vmem>>, vector<1x14x144xf32>
    %17 = vector.shape_cast %16 : vector<1x14x144xf32> to vector<14x144xf32>
    %18 = vector.extract_strided_slice %1 {offsets = [0, 1, 0], sizes = [1, 1, 144], strides = [1, 1, 1]} : vector<5x5x144xf32> to vector<1x1x144xf32>
    %19 = vector.shape_cast %18 : vector<1x1x144xf32> to vector<144xf32>
    %20 = vector.shape_cast %19 : vector<144xf32> to vector<1x144xf32>
    %21 = vector.broadcast %20 : vector<1x144xf32> to vector<14x144xf32>
    %22 = arith.mulf %17, %21 : vector<14x144xf32>
    %23 = arith.addf %14, %22 : vector<14x144xf32>
    %24 = arith.index_cast %5 : i32 to index
    %c1 = arith.constant 1 : index
    %c0_8 = arith.constant 0 : index
    %25 = vector.load %arg1[%24, %c1, %c0_8] : memref<32x16x144xf32, #tpu.memory_space<vmem>>, vector<1x14x144xf32>
    %26 = vector.shape_cast %25 : vector<1x14x144xf32> to vector<14x144xf32>
    %27 = vector.extract_strided_slice %1 {offsets = [0, 2, 0], sizes = [1, 1, 144], strides = [1, 1, 1]} : vector<5x5x144xf32> to vector<1x1x144xf32>
    %28 = vector.shape_cast %27 : vector<1x1x144xf32> to vector<144xf32>
    %29 = vector.shape_cast %28 : vector<144xf32> to vector<1x144xf32>
    %30 = vector.broadcast %29 : vector<1x144xf32> to vector<14x144xf32>
    %31 = arith.mulf %26, %30 : vector<14x144xf32>
    %32 = arith.addf %23, %31 : vector<14x144xf32>
    %33 = arith.index_cast %5 : i32 to index
    %c1_9 = arith.constant 1 : index
    %c0_10 = arith.constant 0 : index
    %34 = vector.load %arg2[%33, %c1_9, %c0_10] : memref<32x16x144xf32, #tpu.memory_space<vmem>>, vector<1x14x144xf32>
    %35 = vector.shape_cast %34 : vector<1x14x144xf32> to vector<14x144xf32>
    %36 = vector.extract_strided_slice %1 {offsets = [0, 3, 0], sizes = [1, 1, 144], strides = [1, 1, 1]} : vector<5x5x144xf32> to vector<1x1x144xf32>
    %37 = vector.shape_cast %36 : vector<1x1x144xf32> to vector<144xf32>
    %38 = vector.shape_cast %37 : vector<144xf32> to vector<1x144xf32>
    %39 = vector.broadcast %38 : vector<1x144xf32> to vector<14x144xf32>
    %40 = arith.mulf %35, %39 : vector<14x144xf32>
    %41 = arith.addf %32, %40 : vector<14x144xf32>
    %42 = arith.index_cast %5 : i32 to index
    %c2 = arith.constant 2 : index
    %c0_11 = arith.constant 0 : index
    %43 = vector.load %arg1[%42, %c2, %c0_11] : memref<32x16x144xf32, #tpu.memory_space<vmem>>, vector<1x14x144xf32>
    %44 = vector.shape_cast %43 : vector<1x14x144xf32> to vector<14x144xf32>
    %45 = vector.extract_strided_slice %1 {offsets = [0, 4, 0], sizes = [1, 1, 144], strides = [1, 1, 1]} : vector<5x5x144xf32> to vector<1x1x144xf32>
    %46 = vector.shape_cast %45 : vector<1x1x144xf32> to vector<144xf32>
    %47 = vector.shape_cast %46 : vector<144xf32> to vector<1x144xf32>
    %48 = vector.broadcast %47 : vector<1x144xf32> to vector<14x144xf32>
    %49 = arith.mulf %44, %48 : vector<14x144xf32>
    %50 = arith.addf %41, %49 : vector<14x144xf32>
    %c2_i32_12 = arith.constant 2 : i32
    %51 = arith.muli %c2_i32_12, %2 : i32
    %c1_i32 = arith.constant 1 : i32
    %52 = arith.addi %51, %c1_i32 : i32
    %53 = arith.index_cast %52 : i32 to index
    %c0_13 = arith.constant 0 : index
    %c0_14 = arith.constant 0 : index
    %54 = vector.load %arg1[%53, %c0_13, %c0_14] : memref<32x16x144xf32, #tpu.memory_space<vmem>>, vector<1x14x144xf32>
    %55 = vector.shape_cast %54 : vector<1x14x144xf32> to vector<14x144xf32>
    %56 = vector.extract_strided_slice %1 {offsets = [1, 0, 0], sizes = [1, 1, 144], strides = [1, 1, 1]} : vector<5x5x144xf32> to vector<1x1x144xf32>
    %57 = vector.shape_cast %56 : vector<1x1x144xf32> to vector<144xf32>
    %58 = vector.shape_cast %57 : vector<144xf32> to vector<1x144xf32>
    %59 = vector.broadcast %58 : vector<1x144xf32> to vector<14x144xf32>
    %60 = arith.mulf %55, %59 : vector<14x144xf32>
    %61 = arith.addf %50, %60 : vector<14x144xf32>
    %62 = arith.index_cast %52 : i32 to index
    %c0_15 = arith.constant 0 : index
    %c0_16 = arith.constant 0 : index
    %63 = vector.load %arg2[%62, %c0_15, %c0_16] : memref<32x16x144xf32, #tpu.memory_space<vmem>>, vector<1x14x144xf32>
    %64 = vector.shape_cast %63 : vector<1x14x144xf32> to vector<14x144xf32>
    %65 = vector.extract_strided_slice %1 {offsets = [1, 1, 0], sizes = [1, 1, 144], strides = [1, 1, 1]} : vector<5x5x144xf32> to vector<1x1x144xf32>
    %66 = vector.shape_cast %65 : vector<1x1x144xf32> to vector<144xf32>
    %67 = vector.shape_cast %66 : vector<144xf32> to vector<1x144xf32>
    %68 = vector.broadcast %67 : vector<1x144xf32> to vector<14x144xf32>
    %69 = arith.mulf %64, %68 : vector<14x144xf32>
    %70 = arith.addf %61, %69 : vector<14x144xf32>
    %71 = arith.index_cast %52 : i32 to index
    %c1_17 = arith.constant 1 : index
    %c0_18 = arith.constant 0 : index
    %72 = vector.load %arg1[%71, %c1_17, %c0_18] : memref<32x16x144xf32, #tpu.memory_space<vmem>>, vector<1x14x144xf32>
    %73 = vector.shape_cast %72 : vector<1x14x144xf32> to vector<14x144xf32>
    %74 = vector.extract_strided_slice %1 {offsets = [1, 2, 0], sizes = [1, 1, 144], strides = [1, 1, 1]} : vector<5x5x144xf32> to vector<1x1x144xf32>
    %75 = vector.shape_cast %74 : vector<1x1x144xf32> to vector<144xf32>
    %76 = vector.shape_cast %75 : vector<144xf32> to vector<1x144xf32>
    %77 = vector.broadcast %76 : vector<1x144xf32> to vector<14x144xf32>
    %78 = arith.mulf %73, %77 : vector<14x144xf32>
    %79 = arith.addf %70, %78 : vector<14x144xf32>
    %80 = arith.index_cast %52 : i32 to index
    %c1_19 = arith.constant 1 : index
    %c0_20 = arith.constant 0 : index
    %81 = vector.load %arg2[%80, %c1_19, %c0_20] : memref<32x16x144xf32, #tpu.memory_space<vmem>>, vector<1x14x144xf32>
    %82 = vector.shape_cast %81 : vector<1x14x144xf32> to vector<14x144xf32>
    %83 = vector.extract_strided_slice %1 {offsets = [1, 3, 0], sizes = [1, 1, 144], strides = [1, 1, 1]} : vector<5x5x144xf32> to vector<1x1x144xf32>
    %84 = vector.shape_cast %83 : vector<1x1x144xf32> to vector<144xf32>
    %85 = vector.shape_cast %84 : vector<144xf32> to vector<1x144xf32>
    %86 = vector.broadcast %85 : vector<1x144xf32> to vector<14x144xf32>
    %87 = arith.mulf %82, %86 : vector<14x144xf32>
    %88 = arith.addf %79, %87 : vector<14x144xf32>
    %89 = arith.index_cast %52 : i32 to index
    %c2_21 = arith.constant 2 : index
    %c0_22 = arith.constant 0 : index
    %90 = vector.load %arg1[%89, %c2_21, %c0_22] : memref<32x16x144xf32, #tpu.memory_space<vmem>>, vector<1x14x144xf32>
    %91 = vector.shape_cast %90 : vector<1x14x144xf32> to vector<14x144xf32>
    %92 = vector.extract_strided_slice %1 {offsets = [1, 4, 0], sizes = [1, 1, 144], strides = [1, 1, 1]} : vector<5x5x144xf32> to vector<1x1x144xf32>
    %93 = vector.shape_cast %92 : vector<1x1x144xf32> to vector<144xf32>
    %94 = vector.shape_cast %93 : vector<144xf32> to vector<1x144xf32>
    %95 = vector.broadcast %94 : vector<1x144xf32> to vector<14x144xf32>
    %96 = arith.mulf %91, %95 : vector<14x144xf32>
    %97 = arith.addf %88, %96 : vector<14x144xf32>
    %c2_i32_23 = arith.constant 2 : i32
    %98 = arith.muli %c2_i32_23, %2 : i32
    %c2_i32_24 = arith.constant 2 : i32
    %99 = arith.addi %98, %c2_i32_24 : i32
    %100 = arith.index_cast %99 : i32 to index
    %c0_25 = arith.constant 0 : index
    %c0_26 = arith.constant 0 : index
    %101 = vector.load %arg1[%100, %c0_25, %c0_26] : memref<32x16x144xf32, #tpu.memory_space<vmem>>, vector<1x14x144xf32>
    %102 = vector.shape_cast %101 : vector<1x14x144xf32> to vector<14x144xf32>
    %103 = vector.extract_strided_slice %1 {offsets = [2, 0, 0], sizes = [1, 1, 144], strides = [1, 1, 1]} : vector<5x5x144xf32> to vector<1x1x144xf32>
    %104 = vector.shape_cast %103 : vector<1x1x144xf32> to vector<144xf32>
    %105 = vector.shape_cast %104 : vector<144xf32> to vector<1x144xf32>
    %106 = vector.broadcast %105 : vector<1x144xf32> to vector<14x144xf32>
    %107 = arith.mulf %102, %106 : vector<14x144xf32>
    %108 = arith.addf %97, %107 : vector<14x144xf32>
    %109 = arith.index_cast %99 : i32 to index
    %c0_27 = arith.constant 0 : index
    %c0_28 = arith.constant 0 : index
    %110 = vector.load %arg2[%109, %c0_27, %c0_28] : memref<32x16x144xf32, #tpu.memory_space<vmem>>, vector<1x14x144xf32>
    %111 = vector.shape_cast %110 : vector<1x14x144xf32> to vector<14x144xf32>
    %112 = vector.extract_strided_slice %1 {offsets = [2, 1, 0], sizes = [1, 1, 144], strides = [1, 1, 1]} : vector<5x5x144xf32> to vector<1x1x144xf32>
    %113 = vector.shape_cast %112 : vector<1x1x144xf32> to vector<144xf32>
    %114 = vector.shape_cast %113 : vector<144xf32> to vector<1x144xf32>
    %115 = vector.broadcast %114 : vector<1x144xf32> to vector<14x144xf32>
    %116 = arith.mulf %111, %115 : vector<14x144xf32>
    %117 = arith.addf %108, %116 : vector<14x144xf32>
    %118 = arith.index_cast %99 : i32 to index
    %c1_29 = arith.constant 1 : index
    %c0_30 = arith.constant 0 : index
    %119 = vector.load %arg1[%118, %c1_29, %c0_30] : memref<32x16x144xf32, #tpu.memory_space<vmem>>, vector<1x14x144xf32>
    %120 = vector.shape_cast %119 : vector<1x14x144xf32> to vector<14x144xf32>
    %121 = vector.extract_strided_slice %1 {offsets = [2, 2, 0], sizes = [1, 1, 144], strides = [1, 1, 1]} : vector<5x5x144xf32> to vector<1x1x144xf32>
    %122 = vector.shape_cast %121 : vector<1x1x144xf32> to vector<144xf32>
    %123 = vector.shape_cast %122 : vector<144xf32> to vector<1x144xf32>
    %124 = vector.broadcast %123 : vector<1x144xf32> to vector<14x144xf32>
    %125 = arith.mulf %120, %124 : vector<14x144xf32>
    %126 = arith.addf %117, %125 : vector<14x144xf32>
    %127 = arith.index_cast %99 : i32 to index
    %c1_31 = arith.constant 1 : index
    %c0_32 = arith.constant 0 : index
    %128 = vector.load %arg2[%127, %c1_31, %c0_32] : memref<32x16x144xf32, #tpu.memory_space<vmem>>, vector<1x14x144xf32>
    %129 = vector.shape_cast %128 : vector<1x14x144xf32> to vector<14x144xf32>
    %130 = vector.extract_strided_slice %1 {offsets = [2, 3, 0], sizes = [1, 1, 144], strides = [1, 1, 1]} : vector<5x5x144xf32> to vector<1x1x144xf32>
    %131 = vector.shape_cast %130 : vector<1x1x144xf32> to vector<144xf32>
    %132 = vector.shape_cast %131 : vector<144xf32> to vector<1x144xf32>
    %133 = vector.broadcast %132 : vector<1x144xf32> to vector<14x144xf32>
    %134 = arith.mulf %129, %133 : vector<14x144xf32>
    %135 = arith.addf %126, %134 : vector<14x144xf32>
    %136 = arith.index_cast %99 : i32 to index
    %c2_33 = arith.constant 2 : index
    %c0_34 = arith.constant 0 : index
    %137 = vector.load %arg1[%136, %c2_33, %c0_34] : memref<32x16x144xf32, #tpu.memory_space<vmem>>, vector<1x14x144xf32>
    %138 = vector.shape_cast %137 : vector<1x14x144xf32> to vector<14x144xf32>
    %139 = vector.extract_strided_slice %1 {offsets = [2, 4, 0], sizes = [1, 1, 144], strides = [1, 1, 1]} : vector<5x5x144xf32> to vector<1x1x144xf32>
    %140 = vector.shape_cast %139 : vector<1x1x144xf32> to vector<144xf32>
    %141 = vector.shape_cast %140 : vector<144xf32> to vector<1x144xf32>
    %142 = vector.broadcast %141 : vector<1x144xf32> to vector<14x144xf32>
    %143 = arith.mulf %138, %142 : vector<14x144xf32>
    %144 = arith.addf %135, %143 : vector<14x144xf32>
    %c2_i32_35 = arith.constant 2 : i32
    %145 = arith.muli %c2_i32_35, %2 : i32
    %c3_i32 = arith.constant 3 : i32
    %146 = arith.addi %145, %c3_i32 : i32
    %147 = arith.index_cast %146 : i32 to index
    %c0_36 = arith.constant 0 : index
    %c0_37 = arith.constant 0 : index
    %148 = vector.load %arg1[%147, %c0_36, %c0_37] : memref<32x16x144xf32, #tpu.memory_space<vmem>>, vector<1x14x144xf32>
    %149 = vector.shape_cast %148 : vector<1x14x144xf32> to vector<14x144xf32>
    %150 = vector.extract_strided_slice %1 {offsets = [3, 0, 0], sizes = [1, 1, 144], strides = [1, 1, 1]} : vector<5x5x144xf32> to vector<1x1x144xf32>
    %151 = vector.shape_cast %150 : vector<1x1x144xf32> to vector<144xf32>
    %152 = vector.shape_cast %151 : vector<144xf32> to vector<1x144xf32>
    %153 = vector.broadcast %152 : vector<1x144xf32> to vector<14x144xf32>
    %154 = arith.mulf %149, %153 : vector<14x144xf32>
    %155 = arith.addf %144, %154 : vector<14x144xf32>
    %156 = arith.index_cast %146 : i32 to index
    %c0_38 = arith.constant 0 : index
    %c0_39 = arith.constant 0 : index
    %157 = vector.load %arg2[%156, %c0_38, %c0_39] : memref<32x16x144xf32, #tpu.memory_space<vmem>>, vector<1x14x144xf32>
    %158 = vector.shape_cast %157 : vector<1x14x144xf32> to vector<14x144xf32>
    %159 = vector.extract_strided_slice %1 {offsets = [3, 1, 0], sizes = [1, 1, 144], strides = [1, 1, 1]} : vector<5x5x144xf32> to vector<1x1x144xf32>
    %160 = vector.shape_cast %159 : vector<1x1x144xf32> to vector<144xf32>
    %161 = vector.shape_cast %160 : vector<144xf32> to vector<1x144xf32>
    %162 = vector.broadcast %161 : vector<1x144xf32> to vector<14x144xf32>
    %163 = arith.mulf %158, %162 : vector<14x144xf32>
    %164 = arith.addf %155, %163 : vector<14x144xf32>
    %165 = arith.index_cast %146 : i32 to index
    %c1_40 = arith.constant 1 : index
    %c0_41 = arith.constant 0 : index
    %166 = vector.load %arg1[%165, %c1_40, %c0_41] : memref<32x16x144xf32, #tpu.memory_space<vmem>>, vector<1x14x144xf32>
    %167 = vector.shape_cast %166 : vector<1x14x144xf32> to vector<14x144xf32>
    %168 = vector.extract_strided_slice %1 {offsets = [3, 2, 0], sizes = [1, 1, 144], strides = [1, 1, 1]} : vector<5x5x144xf32> to vector<1x1x144xf32>
    %169 = vector.shape_cast %168 : vector<1x1x144xf32> to vector<144xf32>
    %170 = vector.shape_cast %169 : vector<144xf32> to vector<1x144xf32>
    %171 = vector.broadcast %170 : vector<1x144xf32> to vector<14x144xf32>
    %172 = arith.mulf %167, %171 : vector<14x144xf32>
    %173 = arith.addf %164, %172 : vector<14x144xf32>
    %174 = arith.index_cast %146 : i32 to index
    %c1_42 = arith.constant 1 : index
    %c0_43 = arith.constant 0 : index
    %175 = vector.load %arg2[%174, %c1_42, %c0_43] : memref<32x16x144xf32, #tpu.memory_space<vmem>>, vector<1x14x144xf32>
    %176 = vector.shape_cast %175 : vector<1x14x144xf32> to vector<14x144xf32>
    %177 = vector.extract_strided_slice %1 {offsets = [3, 3, 0], sizes = [1, 1, 144], strides = [1, 1, 1]} : vector<5x5x144xf32> to vector<1x1x144xf32>
    %178 = vector.shape_cast %177 : vector<1x1x144xf32> to vector<144xf32>
    %179 = vector.shape_cast %178 : vector<144xf32> to vector<1x144xf32>
    %180 = vector.broadcast %179 : vector<1x144xf32> to vector<14x144xf32>
    %181 = arith.mulf %176, %180 : vector<14x144xf32>
    %182 = arith.addf %173, %181 : vector<14x144xf32>
    %183 = arith.index_cast %146 : i32 to index
    %c2_44 = arith.constant 2 : index
    %c0_45 = arith.constant 0 : index
    %184 = vector.load %arg1[%183, %c2_44, %c0_45] : memref<32x16x144xf32, #tpu.memory_space<vmem>>, vector<1x14x144xf32>
    %185 = vector.shape_cast %184 : vector<1x14x144xf32> to vector<14x144xf32>
    %186 = vector.extract_strided_slice %1 {offsets = [3, 4, 0], sizes = [1, 1, 144], strides = [1, 1, 1]} : vector<5x5x144xf32> to vector<1x1x144xf32>
    %187 = vector.shape_cast %186 : vector<1x1x144xf32> to vector<144xf32>
    %188 = vector.shape_cast %187 : vector<144xf32> to vector<1x144xf32>
    %189 = vector.broadcast %188 : vector<1x144xf32> to vector<14x144xf32>
    %190 = arith.mulf %185, %189 : vector<14x144xf32>
    %191 = arith.addf %182, %190 : vector<14x144xf32>
    %c2_i32_46 = arith.constant 2 : i32
    %192 = arith.muli %c2_i32_46, %2 : i32
    %c4_i32 = arith.constant 4 : i32
    %193 = arith.addi %192, %c4_i32 : i32
    %194 = arith.index_cast %193 : i32 to index
    %c0_47 = arith.constant 0 : index
    %c0_48 = arith.constant 0 : index
    %195 = vector.load %arg1[%194, %c0_47, %c0_48] : memref<32x16x144xf32, #tpu.memory_space<vmem>>, vector<1x14x144xf32>
    %196 = vector.shape_cast %195 : vector<1x14x144xf32> to vector<14x144xf32>
    %197 = vector.extract_strided_slice %1 {offsets = [4, 0, 0], sizes = [1, 1, 144], strides = [1, 1, 1]} : vector<5x5x144xf32> to vector<1x1x144xf32>
    %198 = vector.shape_cast %197 : vector<1x1x144xf32> to vector<144xf32>
    %199 = vector.shape_cast %198 : vector<144xf32> to vector<1x144xf32>
    %200 = vector.broadcast %199 : vector<1x144xf32> to vector<14x144xf32>
    %201 = arith.mulf %196, %200 : vector<14x144xf32>
    %202 = arith.addf %191, %201 : vector<14x144xf32>
    %203 = arith.index_cast %193 : i32 to index
    %c0_49 = arith.constant 0 : index
    %c0_50 = arith.constant 0 : index
    %204 = vector.load %arg2[%203, %c0_49, %c0_50] : memref<32x16x144xf32, #tpu.memory_space<vmem>>, vector<1x14x144xf32>
    %205 = vector.shape_cast %204 : vector<1x14x144xf32> to vector<14x144xf32>
    %206 = vector.extract_strided_slice %1 {offsets = [4, 1, 0], sizes = [1, 1, 144], strides = [1, 1, 1]} : vector<5x5x144xf32> to vector<1x1x144xf32>
    %207 = vector.shape_cast %206 : vector<1x1x144xf32> to vector<144xf32>
    %208 = vector.shape_cast %207 : vector<144xf32> to vector<1x144xf32>
    %209 = vector.broadcast %208 : vector<1x144xf32> to vector<14x144xf32>
    %210 = arith.mulf %205, %209 : vector<14x144xf32>
    %211 = arith.addf %202, %210 : vector<14x144xf32>
    %212 = arith.index_cast %193 : i32 to index
    %c1_51 = arith.constant 1 : index
    %c0_52 = arith.constant 0 : index
    %213 = vector.load %arg1[%212, %c1_51, %c0_52] : memref<32x16x144xf32, #tpu.memory_space<vmem>>, vector<1x14x144xf32>
    %214 = vector.shape_cast %213 : vector<1x14x144xf32> to vector<14x144xf32>
    %215 = vector.extract_strided_slice %1 {offsets = [4, 2, 0], sizes = [1, 1, 144], strides = [1, 1, 1]} : vector<5x5x144xf32> to vector<1x1x144xf32>
    %216 = vector.shape_cast %215 : vector<1x1x144xf32> to vector<144xf32>
    %217 = vector.shape_cast %216 : vector<144xf32> to vector<1x144xf32>
    %218 = vector.broadcast %217 : vector<1x144xf32> to vector<14x144xf32>
    %219 = arith.mulf %214, %218 : vector<14x144xf32>
    %220 = arith.addf %211, %219 : vector<14x144xf32>
    %221 = arith.index_cast %193 : i32 to index
    %c1_53 = arith.constant 1 : index
    %c0_54 = arith.constant 0 : index
    %222 = vector.load %arg2[%221, %c1_53, %c0_54] : memref<32x16x144xf32, #tpu.memory_space<vmem>>, vector<1x14x144xf32>
    %223 = vector.shape_cast %222 : vector<1x14x144xf32> to vector<14x144xf32>
    %224 = vector.extract_strided_slice %1 {offsets = [4, 3, 0], sizes = [1, 1, 144], strides = [1, 1, 1]} : vector<5x5x144xf32> to vector<1x1x144xf32>
    %225 = vector.shape_cast %224 : vector<1x1x144xf32> to vector<144xf32>
    %226 = vector.shape_cast %225 : vector<144xf32> to vector<1x144xf32>
    %227 = vector.broadcast %226 : vector<1x144xf32> to vector<14x144xf32>
    %228 = arith.mulf %223, %227 : vector<14x144xf32>
    %229 = arith.addf %220, %228 : vector<14x144xf32>
    %230 = arith.index_cast %193 : i32 to index
    %c2_55 = arith.constant 2 : index
    %c0_56 = arith.constant 0 : index
    %231 = vector.load %arg1[%230, %c2_55, %c0_56] : memref<32x16x144xf32, #tpu.memory_space<vmem>>, vector<1x14x144xf32>
    %232 = vector.shape_cast %231 : vector<1x14x144xf32> to vector<14x144xf32>
    %233 = vector.extract_strided_slice %1 {offsets = [4, 4, 0], sizes = [1, 1, 144], strides = [1, 1, 1]} : vector<5x5x144xf32> to vector<1x1x144xf32>
    %234 = vector.shape_cast %233 : vector<1x1x144xf32> to vector<144xf32>
    %235 = vector.shape_cast %234 : vector<144xf32> to vector<1x144xf32>
    %236 = vector.broadcast %235 : vector<1x144xf32> to vector<14x144xf32>
    %237 = arith.mulf %232, %236 : vector<14x144xf32>
    %238 = arith.addf %229, %237 : vector<14x144xf32>
    %c0_57 = arith.constant 0 : index
    %c0_58 = arith.constant 0 : index
    %c0_59 = arith.constant 0 : index
    %239 = vector.load %arg4[%c0_57, %c0_58, %c0_59] : memref<2x14x144xf32, #tpu.memory_space<vmem>>, vector<1x14x144xf32>
    %240 = vector.shape_cast %239 : vector<1x14x144xf32> to vector<14x144xf32>
    %241 = vector.shape_cast %238 : vector<14x144xf32> to vector<1x14x144xf32>
    tpu.vector_store %arg4[%c0_57, %c0_58, %c0_59], %241 {strides = array<i32>} : memref<2x14x144xf32, #tpu.memory_space<vmem>>, vector<1x14x144xf32>,
    %c1_i32_60 = arith.constant 1 : i32
    %242 = arith.addi %0, %c1_i32_60 : i32
    %cst_61 = arith.constant 0.000000e+00 : f32
    %243 = vector.broadcast %cst_61 : f32 to vector<14x144xf32>
    %c2_i32_62 = arith.constant 2 : i32
    %244 = arith.muli %c2_i32_62, %242 : i32
    %c0_i32_63 = arith.constant 0 : i32
    %245 = arith.addi %244, %c0_i32_63 : i32
    %246 = arith.index_cast %245 : i32 to index
    %c0_64 = arith.constant 0 : index
    %c0_65 = arith.constant 0 : index
    %247 = vector.load %arg1[%246, %c0_64, %c0_65] : memref<32x16x144xf32, #tpu.memory_space<vmem>>, vector<1x14x144xf32>
    %248 = vector.shape_cast %247 : vector<1x14x144xf32> to vector<14x144xf32>
    %249 = vector.extract_strided_slice %1 {offsets = [0, 0, 0], sizes = [1, 1, 144], strides = [1, 1, 1]} : vector<5x5x144xf32> to vector<1x1x144xf32>
    %250 = vector.shape_cast %249 : vector<1x1x144xf32> to vector<144xf32>
    %251 = vector.shape_cast %250 : vector<144xf32> to vector<1x144xf32>
    %252 = vector.broadcast %251 : vector<1x144xf32> to vector<14x144xf32>
    %253 = arith.mulf %248, %252 : vector<14x144xf32>
    %254 = arith.addf %243, %253 : vector<14x144xf32>
    %255 = arith.index_cast %245 : i32 to index
    %c0_66 = arith.constant 0 : index
    %c0_67 = arith.constant 0 : index
    %256 = vector.load %arg2[%255, %c0_66, %c0_67] : memref<32x16x144xf32, #tpu.memory_space<vmem>>, vector<1x14x144xf32>
    %257 = vector.shape_cast %256 : vector<1x14x144xf32> to vector<14x144xf32>
    %258 = vector.extract_strided_slice %1 {offsets = [0, 1, 0], sizes = [1, 1, 144], strides = [1, 1, 1]} : vector<5x5x144xf32> to vector<1x1x144xf32>
    %259 = vector.shape_cast %258 : vector<1x1x144xf32> to vector<144xf32>
    %260 = vector.shape_cast %259 : vector<144xf32> to vector<1x144xf32>
    %261 = vector.broadcast %260 : vector<1x144xf32> to vector<14x144xf32>
    %262 = arith.mulf %257, %261 : vector<14x144xf32>
    %263 = arith.addf %254, %262 : vector<14x144xf32>
    %264 = arith.index_cast %245 : i32 to index
    %c1_68 = arith.constant 1 : index
    %c0_69 = arith.constant 0 : index
    %265 = vector.load %arg1[%264, %c1_68, %c0_69] : memref<32x16x144xf32, #tpu.memory_space<vmem>>, vector<1x14x144xf32>
    %266 = vector.shape_cast %265 : vector<1x14x144xf32> to vector<14x144xf32>
    %267 = vector.extract_strided_slice %1 {offsets = [0, 2, 0], sizes = [1, 1, 144], strides = [1, 1, 1]} : vector<5x5x144xf32> to vector<1x1x144xf32>
    %268 = vector.shape_cast %267 : vector<1x1x144xf32> to vector<144xf32>
    %269 = vector.shape_cast %268 : vector<144xf32> to vector<1x144xf32>
    %270 = vector.broadcast %269 : vector<1x144xf32> to vector<14x144xf32>
    %271 = arith.mulf %266, %270 : vector<14x144xf32>
    %272 = arith.addf %263, %271 : vector<14x144xf32>
    %273 = arith.index_cast %245 : i32 to index
    %c1_70 = arith.constant 1 : index
    %c0_71 = arith.constant 0 : index
    %274 = vector.load %arg2[%273, %c1_70, %c0_71] : memref<32x16x144xf32, #tpu.memory_space<vmem>>, vector<1x14x144xf32>
    %275 = vector.shape_cast %274 : vector<1x14x144xf32> to vector<14x144xf32>
    %276 = vector.extract_strided_slice %1 {offsets = [0, 3, 0], sizes = [1, 1, 144], strides = [1, 1, 1]} : vector<5x5x144xf32> to vector<1x1x144xf32>
    %277 = vector.shape_cast %276 : vector<1x1x144xf32> to vector<144xf32>
    %278 = vector.shape_cast %277 : vector<144xf32> to vector<1x144xf32>
    %279 = vector.broadcast %278 : vector<1x144xf32> to vector<14x144xf32>
    %280 = arith.mulf %275, %279 : vector<14x144xf32>
    %281 = arith.addf %272, %280 : vector<14x144xf32>
    %282 = arith.index_cast %245 : i32 to index
    %c2_72 = arith.constant 2 : index
    %c0_73 = arith.constant 0 : index
    %283 = vector.load %arg1[%282, %c2_72, %c0_73] : memref<32x16x144xf32, #tpu.memory_space<vmem>>, vector<1x14x144xf32>
    %284 = vector.shape_cast %283 : vector<1x14x144xf32> to vector<14x144xf32>
    %285 = vector.extract_strided_slice %1 {offsets = [0, 4, 0], sizes = [1, 1, 144], strides = [1, 1, 1]} : vector<5x5x144xf32> to vector<1x1x144xf32>
    %286 = vector.shape_cast %285 : vector<1x1x144xf32> to vector<144xf32>
    %287 = vector.shape_cast %286 : vector<144xf32> to vector<1x144xf32>
    %288 = vector.broadcast %287 : vector<1x144xf32> to vector<14x144xf32>
    %289 = arith.mulf %284, %288 : vector<14x144xf32>
    %290 = arith.addf %281, %289 : vector<14x144xf32>
    %c2_i32_74 = arith.constant 2 : i32
    %291 = arith.muli %c2_i32_74, %242 : i32
    %c1_i32_75 = arith.constant 1 : i32
    %292 = arith.addi %291, %c1_i32_75 : i32
    %293 = arith.index_cast %292 : i32 to index
    %c0_76 = arith.constant 0 : index
    %c0_77 = arith.constant 0 : index
    %294 = vector.load %arg1[%293, %c0_76, %c0_77] : memref<32x16x144xf32, #tpu.memory_space<vmem>>, vector<1x14x144xf32>
    %295 = vector.shape_cast %294 : vector<1x14x144xf32> to vector<14x144xf32>
    %296 = vector.extract_strided_slice %1 {offsets = [1, 0, 0], sizes = [1, 1, 144], strides = [1, 1, 1]} : vector<5x5x144xf32> to vector<1x1x144xf32>
    %297 = vector.shape_cast %296 : vector<1x1x144xf32> to vector<144xf32>
    %298 = vector.shape_cast %297 : vector<144xf32> to vector<1x144xf32>
    %299 = vector.broadcast %298 : vector<1x144xf32> to vector<14x144xf32>
    %300 = arith.mulf %295, %299 : vector<14x144xf32>
    %301 = arith.addf %290, %300 : vector<14x144xf32>
    %302 = arith.index_cast %292 : i32 to index
    %c0_78 = arith.constant 0 : index
    %c0_79 = arith.constant 0 : index
    %303 = vector.load %arg2[%302, %c0_78, %c0_79] : memref<32x16x144xf32, #tpu.memory_space<vmem>>, vector<1x14x144xf32>
    %304 = vector.shape_cast %303 : vector<1x14x144xf32> to vector<14x144xf32>
    %305 = vector.extract_strided_slice %1 {offsets = [1, 1, 0], sizes = [1, 1, 144], strides = [1, 1, 1]} : vector<5x5x144xf32> to vector<1x1x144xf32>
    %306 = vector.shape_cast %305 : vector<1x1x144xf32> to vector<144xf32>
    %307 = vector.shape_cast %306 : vector<144xf32> to vector<1x144xf32>
    %308 = vector.broadcast %307 : vector<1x144xf32> to vector<14x144xf32>
    %309 = arith.mulf %304, %308 : vector<14x144xf32>
    %310 = arith.addf %301, %309 : vector<14x144xf32>
    %311 = arith.index_cast %292 : i32 to index
    %c1_80 = arith.constant 1 : index
    %c0_81 = arith.constant 0 : index
    %312 = vector.load %arg1[%311, %c1_80, %c0_81] : memref<32x16x144xf32, #tpu.memory_space<vmem>>, vector<1x14x144xf32>
    %313 = vector.shape_cast %312 : vector<1x14x144xf32> to vector<14x144xf32>
    %314 = vector.extract_strided_slice %1 {offsets = [1, 2, 0], sizes = [1, 1, 144], strides = [1, 1, 1]} : vector<5x5x144xf32> to vector<1x1x144xf32>
    %315 = vector.shape_cast %314 : vector<1x1x144xf32> to vector<144xf32>
    %316 = vector.shape_cast %315 : vector<144xf32> to vector<1x144xf32>
    %317 = vector.broadcast %316 : vector<1x144xf32> to vector<14x144xf32>
    %318 = arith.mulf %313, %317 : vector<14x144xf32>
    %319 = arith.addf %310, %318 : vector<14x144xf32>
    %320 = arith.index_cast %292 : i32 to index
    %c1_82 = arith.constant 1 : index
    %c0_83 = arith.constant 0 : index
    %321 = vector.load %arg2[%320, %c1_82, %c0_83] : memref<32x16x144xf32, #tpu.memory_space<vmem>>, vector<1x14x144xf32>
    %322 = vector.shape_cast %321 : vector<1x14x144xf32> to vector<14x144xf32>
    %323 = vector.extract_strided_slice %1 {offsets = [1, 3, 0], sizes = [1, 1, 144], strides = [1, 1, 1]} : vector<5x5x144xf32> to vector<1x1x144xf32>
    %324 = vector.shape_cast %323 : vector<1x1x144xf32> to vector<144xf32>
    %325 = vector.shape_cast %324 : vector<144xf32> to vector<1x144xf32>
    %326 = vector.broadcast %325 : vector<1x144xf32> to vector<14x144xf32>
    %327 = arith.mulf %322, %326 : vector<14x144xf32>
    %328 = arith.addf %319, %327 : vector<14x144xf32>
    %329 = arith.index_cast %292 : i32 to index
    %c2_84 = arith.constant 2 : index
    %c0_85 = arith.constant 0 : index
    %330 = vector.load %arg1[%329, %c2_84, %c0_85] : memref<32x16x144xf32, #tpu.memory_space<vmem>>, vector<1x14x144xf32>
    %331 = vector.shape_cast %330 : vector<1x14x144xf32> to vector<14x144xf32>
    %332 = vector.extract_strided_slice %1 {offsets = [1, 4, 0], sizes = [1, 1, 144], strides = [1, 1, 1]} : vector<5x5x144xf32> to vector<1x1x144xf32>
    %333 = vector.shape_cast %332 : vector<1x1x144xf32> to vector<144xf32>
    %334 = vector.shape_cast %333 : vector<144xf32> to vector<1x144xf32>
    %335 = vector.broadcast %334 : vector<1x144xf32> to vector<14x144xf32>
    %336 = arith.mulf %331, %335 : vector<14x144xf32>
    %337 = arith.addf %328, %336 : vector<14x144xf32>
    %c2_i32_86 = arith.constant 2 : i32
    %338 = arith.muli %c2_i32_86, %242 : i32
    %c2_i32_87 = arith.constant 2 : i32
    %339 = arith.addi %338, %c2_i32_87 : i32
    %340 = arith.index_cast %339 : i32 to index
    %c0_88 = arith.constant 0 : index
    %c0_89 = arith.constant 0 : index
    %341 = vector.load %arg1[%340, %c0_88, %c0_89] : memref<32x16x144xf32, #tpu.memory_space<vmem>>, vector<1x14x144xf32>
    %342 = vector.shape_cast %341 : vector<1x14x144xf32> to vector<14x144xf32>
    %343 = vector.extract_strided_slice %1 {offsets = [2, 0, 0], sizes = [1, 1, 144], strides = [1, 1, 1]} : vector<5x5x144xf32> to vector<1x1x144xf32>
    %344 = vector.shape_cast %343 : vector<1x1x144xf32> to vector<144xf32>
    %345 = vector.shape_cast %344 : vector<144xf32> to vector<1x144xf32>
    %346 = vector.broadcast %345 : vector<1x144xf32> to vector<14x144xf32>
    %347 = arith.mulf %342, %346 : vector<14x144xf32>
    %348 = arith.addf %337, %347 : vector<14x144xf32>
    %349 = arith.index_cast %339 : i32 to index
    %c0_90 = arith.constant 0 : index
    %c0_91 = arith.constant 0 : index
    %350 = vector.load %arg2[%349, %c0_90, %c0_91] : memref<32x16x144xf32, #tpu.memory_space<vmem>>, vector<1x14x144xf32>
    %351 = vector.shape_cast %350 : vector<1x14x144xf32> to vector<14x144xf32>
    %352 = vector.extract_strided_slice %1 {offsets = [2, 1, 0], sizes = [1, 1, 144], strides = [1, 1, 1]} : vector<5x5x144xf32> to vector<1x1x144xf32>
    %353 = vector.shape_cast %352 : vector<1x1x144xf32> to vector<144xf32>
    %354 = vector.shape_cast %353 : vector<144xf32> to vector<1x144xf32>
    %355 = vector.broadcast %354 : vector<1x144xf32> to vector<14x144xf32>
    %356 = arith.mulf %351, %355 : vector<14x144xf32>
    %357 = arith.addf %348, %356 : vector<14x144xf32>
    %358 = arith.index_cast %339 : i32 to index
    %c1_92 = arith.constant 1 : index
    %c0_93 = arith.constant 0 : index
    %359 = vector.load %arg1[%358, %c1_92, %c0_93] : memref<32x16x144xf32, #tpu.memory_space<vmem>>, vector<1x14x144xf32>
    %360 = vector.shape_cast %359 : vector<1x14x144xf32> to vector<14x144xf32>
    %361 = vector.extract_strided_slice %1 {offsets = [2, 2, 0], sizes = [1, 1, 144], strides = [1, 1, 1]} : vector<5x5x144xf32> to vector<1x1x144xf32>
    %362 = vector.shape_cast %361 : vector<1x1x144xf32> to vector<144xf32>
    %363 = vector.shape_cast %362 : vector<144xf32> to vector<1x144xf32>
    %364 = vector.broadcast %363 : vector<1x144xf32> to vector<14x144xf32>
    %365 = arith.mulf %360, %364 : vector<14x144xf32>
    %366 = arith.addf %357, %365 : vector<14x144xf32>
    %367 = arith.index_cast %339 : i32 to index
    %c1_94 = arith.constant 1 : index
    %c0_95 = arith.constant 0 : index
    %368 = vector.load %arg2[%367, %c1_94, %c0_95] : memref<32x16x144xf32, #tpu.memory_space<vmem>>, vector<1x14x144xf32>
    %369 = vector.shape_cast %368 : vector<1x14x144xf32> to vector<14x144xf32>
    %370 = vector.extract_strided_slice %1 {offsets = [2, 3, 0], sizes = [1, 1, 144], strides = [1, 1, 1]} : vector<5x5x144xf32> to vector<1x1x144xf32>
    %371 = vector.shape_cast %370 : vector<1x1x144xf32> to vector<144xf32>
    %372 = vector.shape_cast %371 : vector<144xf32> to vector<1x144xf32>
    %373 = vector.broadcast %372 : vector<1x144xf32> to vector<14x144xf32>
    %374 = arith.mulf %369, %373 : vector<14x144xf32>
    %375 = arith.addf %366, %374 : vector<14x144xf32>
    %376 = arith.index_cast %339 : i32 to index
    %c2_96 = arith.constant 2 : index
    %c0_97 = arith.constant 0 : index
    %377 = vector.load %arg1[%376, %c2_96, %c0_97] : memref<32x16x144xf32, #tpu.memory_space<vmem>>, vector<1x14x144xf32>
    %378 = vector.shape_cast %377 : vector<1x14x144xf32> to vector<14x144xf32>
    %379 = vector.extract_strided_slice %1 {offsets = [2, 4, 0], sizes = [1, 1, 144], strides = [1, 1, 1]} : vector<5x5x144xf32> to vector<1x1x144xf32>
    %380 = vector.shape_cast %379 : vector<1x1x144xf32> to vector<144xf32>
    %381 = vector.shape_cast %380 : vector<144xf32> to vector<1x144xf32>
    %382 = vector.broadcast %381 : vector<1x144xf32> to vector<14x144xf32>
    %383 = arith.mulf %378, %382 : vector<14x144xf32>
    %384 = arith.addf %375, %383 : vector<14x144xf32>
    %c2_i32_98 = arith.constant 2 : i32
    %385 = arith.muli %c2_i32_98, %242 : i32
    %c3_i32_99 = arith.constant 3 : i32
    %386 = arith.addi %385, %c3_i32_99 : i32
    %387 = arith.index_cast %386 : i32 to index
    %c0_100 = arith.constant 0 : index
    %c0_101 = arith.constant 0 : index
    %388 = vector.load %arg1[%387, %c0_100, %c0_101] : memref<32x16x144xf32, #tpu.memory_space<vmem>>, vector<1x14x144xf32>
    %389 = vector.shape_cast %388 : vector<1x14x144xf32> to vector<14x144xf32>
    %390 = vector.extract_strided_slice %1 {offsets = [3, 0, 0], sizes = [1, 1, 144], strides = [1, 1, 1]} : vector<5x5x144xf32> to vector<1x1x144xf32>
    %391 = vector.shape_cast %390 : vector<1x1x144xf32> to vector<144xf32>
    %392 = vector.shape_cast %391 : vector<144xf32> to vector<1x144xf32>
    %393 = vector.broadcast %392 : vector<1x144xf32> to vector<14x144xf32>
    %394 = arith.mulf %389, %393 : vector<14x144xf32>
    %395 = arith.addf %384, %394 : vector<14x144xf32>
    %396 = arith.index_cast %386 : i32 to index
    %c0_102 = arith.constant 0 : index
    %c0_103 = arith.constant 0 : index
    %397 = vector.load %arg2[%396, %c0_102, %c0_103] : memref<32x16x144xf32, #tpu.memory_space<vmem>>, vector<1x14x144xf32>
    %398 = vector.shape_cast %397 : vector<1x14x144xf32> to vector<14x144xf32>
    %399 = vector.extract_strided_slice %1 {offsets = [3, 1, 0], sizes = [1, 1, 144], strides = [1, 1, 1]} : vector<5x5x144xf32> to vector<1x1x144xf32>
    %400 = vector.shape_cast %399 : vector<1x1x144xf32> to vector<144xf32>
    %401 = vector.shape_cast %400 : vector<144xf32> to vector<1x144xf32>
    %402 = vector.broadcast %401 : vector<1x144xf32> to vector<14x144xf32>
    %403 = arith.mulf %398, %402 : vector<14x144xf32>
    %404 = arith.addf %395, %403 : vector<14x144xf32>
    %405 = arith.index_cast %386 : i32 to index
    %c1_104 = arith.constant 1 : index
    %c0_105 = arith.constant 0 : index
    %406 = vector.load %arg1[%405, %c1_104, %c0_105] : memref<32x16x144xf32, #tpu.memory_space<vmem>>, vector<1x14x144xf32>
    %407 = vector.shape_cast %406 : vector<1x14x144xf32> to vector<14x144xf32>
    %408 = vector.extract_strided_slice %1 {offsets = [3, 2, 0], sizes = [1, 1, 144], strides = [1, 1, 1]} : vector<5x5x144xf32> to vector<1x1x144xf32>
    %409 = vector.shape_cast %408 : vector<1x1x144xf32> to vector<144xf32>
    %410 = vector.shape_cast %409 : vector<144xf32> to vector<1x144xf32>
    %411 = vector.broadcast %410 : vector<1x144xf32> to vector<14x144xf32>
    %412 = arith.mulf %407, %411 : vector<14x144xf32>
    %413 = arith.addf %404, %412 : vector<14x144xf32>
    %414 = arith.index_cast %386 : i32 to index
    %c1_106 = arith.constant 1 : index
    %c0_107 = arith.constant 0 : index
    %415 = vector.load %arg2[%414, %c1_106, %c0_107] : memref<32x16x144xf32, #tpu.memory_space<vmem>>, vector<1x14x144xf32>
    %416 = vector.shape_cast %415 : vector<1x14x144xf32> to vector<14x144xf32>
    %417 = vector.extract_strided_slice %1 {offsets = [3, 3, 0], sizes = [1, 1, 144], strides = [1, 1, 1]} : vector<5x5x144xf32> to vector<1x1x144xf32>
    %418 = vector.shape_cast %417 : vector<1x1x144xf32> to vector<144xf32>
    %419 = vector.shape_cast %418 : vector<144xf32> to vector<1x144xf32>
    %420 = vector.broadcast %419 : vector<1x144xf32> to vector<14x144xf32>
    %421 = arith.mulf %416, %420 : vector<14x144xf32>
    %422 = arith.addf %413, %421 : vector<14x144xf32>
    %423 = arith.index_cast %386 : i32 to index
    %c2_108 = arith.constant 2 : index
    %c0_109 = arith.constant 0 : index
    %424 = vector.load %arg1[%423, %c2_108, %c0_109] : memref<32x16x144xf32, #tpu.memory_space<vmem>>, vector<1x14x144xf32>
    %425 = vector.shape_cast %424 : vector<1x14x144xf32> to vector<14x144xf32>
    %426 = vector.extract_strided_slice %1 {offsets = [3, 4, 0], sizes = [1, 1, 144], strides = [1, 1, 1]} : vector<5x5x144xf32> to vector<1x1x144xf32>
    %427 = vector.shape_cast %426 : vector<1x1x144xf32> to vector<144xf32>
    %428 = vector.shape_cast %427 : vector<144xf32> to vector<1x144xf32>
    %429 = vector.broadcast %428 : vector<1x144xf32> to vector<14x144xf32>
    %430 = arith.mulf %425, %429 : vector<14x144xf32>
    %431 = arith.addf %422, %430 : vector<14x144xf32>
    %c2_i32_110 = arith.constant 2 : i32
    %432 = arith.muli %c2_i32_110, %242 : i32
    %c4_i32_111 = arith.constant 4 : i32
    %433 = arith.addi %432, %c4_i32_111 : i32
    %434 = arith.index_cast %433 : i32 to index
    %c0_112 = arith.constant 0 : index
    %c0_113 = arith.constant 0 : index
    %435 = vector.load %arg1[%434, %c0_112, %c0_113] : memref<32x16x144xf32, #tpu.memory_space<vmem>>, vector<1x14x144xf32>
    %436 = vector.shape_cast %435 : vector<1x14x144xf32> to vector<14x144xf32>
    %437 = vector.extract_strided_slice %1 {offsets = [4, 0, 0], sizes = [1, 1, 144], strides = [1, 1, 1]} : vector<5x5x144xf32> to vector<1x1x144xf32>
    %438 = vector.shape_cast %437 : vector<1x1x144xf32> to vector<144xf32>
    %439 = vector.shape_cast %438 : vector<144xf32> to vector<1x144xf32>
    %440 = vector.broadcast %439 : vector<1x144xf32> to vector<14x144xf32>
    %441 = arith.mulf %436, %440 : vector<14x144xf32>
    %442 = arith.addf %431, %441 : vector<14x144xf32>
    %443 = arith.index_cast %433 : i32 to index
    %c0_114 = arith.constant 0 : index
    %c0_115 = arith.constant 0 : index
    %444 = vector.load %arg2[%443, %c0_114, %c0_115] : memref<32x16x144xf32, #tpu.memory_space<vmem>>, vector<1x14x144xf32>
    %445 = vector.shape_cast %444 : vector<1x14x144xf32> to vector<14x144xf32>
    %446 = vector.extract_strided_slice %1 {offsets = [4, 1, 0], sizes = [1, 1, 144], strides = [1, 1, 1]} : vector<5x5x144xf32> to vector<1x1x144xf32>
    %447 = vector.shape_cast %446 : vector<1x1x144xf32> to vector<144xf32>
    %448 = vector.shape_cast %447 : vector<144xf32> to vector<1x144xf32>
    %449 = vector.broadcast %448 : vector<1x144xf32> to vector<14x144xf32>
    %450 = arith.mulf %445, %449 : vector<14x144xf32>
    %451 = arith.addf %442, %450 : vector<14x144xf32>
    %452 = arith.index_cast %433 : i32 to index
    %c1_116 = arith.constant 1 : index
    %c0_117 = arith.constant 0 : index
    %453 = vector.load %arg1[%452, %c1_116, %c0_117] : memref<32x16x144xf32, #tpu.memory_space<vmem>>, vector<1x14x144xf32>
    %454 = vector.shape_cast %453 : vector<1x14x144xf32> to vector<14x144xf32>
    %455 = vector.extract_strided_slice %1 {offsets = [4, 2, 0], sizes = [1, 1, 144], strides = [1, 1, 1]} : vector<5x5x144xf32> to vector<1x1x144xf32>
    %456 = vector.shape_cast %455 : vector<1x1x144xf32> to vector<144xf32>
    %457 = vector.shape_cast %456 : vector<144xf32> to vector<1x144xf32>
    %458 = vector.broadcast %457 : vector<1x144xf32> to vector<14x144xf32>
    %459 = arith.mulf %454, %458 : vector<14x144xf32>
    %460 = arith.addf %451, %459 : vector<14x144xf32>
    %461 = arith.index_cast %433 : i32 to index
    %c1_118 = arith.constant 1 : index
    %c0_119 = arith.constant 0 : index
    %462 = vector.load %arg2[%461, %c1_118, %c0_119] : memref<32x16x144xf32, #tpu.memory_space<vmem>>, vector<1x14x144xf32>
    %463 = vector.shape_cast %462 : vector<1x14x144xf32> to vector<14x144xf32>
    %464 = vector.extract_strided_slice %1 {offsets = [4, 3, 0], sizes = [1, 1, 144], strides = [1, 1, 1]} : vector<5x5x144xf32> to vector<1x1x144xf32>
    %465 = vector.shape_cast %464 : vector<1x1x144xf32> to vector<144xf32>
    %466 = vector.shape_cast %465 : vector<144xf32> to vector<1x144xf32>
    %467 = vector.broadcast %466 : vector<1x144xf32> to vector<14x144xf32>
    %468 = arith.mulf %463, %467 : vector<14x144xf32>
    %469 = arith.addf %460, %468 : vector<14x144xf32>
    %470 = arith.index_cast %433 : i32 to index
    %c2_120 = arith.constant 2 : index
    %c0_121 = arith.constant 0 : index
    %471 = vector.load %arg1[%470, %c2_120, %c0_121] : memref<32x16x144xf32, #tpu.memory_space<vmem>>, vector<1x14x144xf32>
    %472 = vector.shape_cast %471 : vector<1x14x144xf32> to vector<14x144xf32>
    %473 = vector.extract_strided_slice %1 {offsets = [4, 4, 0], sizes = [1, 1, 144], strides = [1, 1, 1]} : vector<5x5x144xf32> to vector<1x1x144xf32>
    %474 = vector.shape_cast %473 : vector<1x1x144xf32> to vector<144xf32>
    %475 = vector.shape_cast %474 : vector<144xf32> to vector<1x144xf32>
    %476 = vector.broadcast %475 : vector<1x144xf32> to vector<14x144xf32>
    %477 = arith.mulf %472, %476 : vector<14x144xf32>
    %478 = arith.addf %469, %477 : vector<14x144xf32>
    %c1_122 = arith.constant 1 : index
    %c0_123 = arith.constant 0 : index
    %c0_124 = arith.constant 0 : index
    %479 = vector.load %arg4[%c1_122, %c0_123, %c0_124] : memref<2x14x144xf32, #tpu.memory_space<vmem>>, vector<1x14x144xf32>
    %480 = vector.shape_cast %479 : vector<1x14x144xf32> to vector<14x144xf32>
    %481 = vector.shape_cast %478 : vector<14x144xf32> to vector<1x14x144xf32>
    tpu.vector_store %arg4[%c1_122, %c0_123, %c0_124], %481 {strides = array<i32>} : memref<2x14x144xf32, #tpu.memory_space<vmem>>, vector<1x14x144xf32>,
    return
  }
  func.func @transform_0(%arg0: i32) -> (i32, i32, i32) {
    %c0_i32 = arith.constant 0 : i32
    %c0_i32_0 = arith.constant 0 : i32
    %c0_i32_1 = arith.constant 0 : i32
    %c0_i32_2 = arith.constant 0 : i32
    return %c0_i32, %c0_i32_0, %c0_i32_1 : i32, i32, i32
  }
  func.func @transform_1(%arg0: i32) -> (i32, i32, i32) {
    %c0_i32 = arith.constant 0 : i32
    %c0_i32_0 = arith.constant 0 : i32
    %c0_i32_1 = arith.constant 0 : i32
    %c0_i32_2 = arith.constant 0 : i32
    return %c0_i32, %c0_i32_0, %c0_i32_1 : i32, i32, i32
  }
  func.func @transform_2(%arg0: i32) -> (i32, i32, i32) {
    %c0_i32 = arith.constant 0 : i32
    %c0_i32_0 = arith.constant 0 : i32
    %c0_i32_1 = arith.constant 0 : i32
    %c0_i32_2 = arith.constant 0 : i32
    return %c0_i32, %c0_i32_0, %c0_i32_1 : i32, i32, i32
  }
  func.func @transform_3(%arg0: i32) -> (i32, i32, i32) {
    %c0_i32 = arith.constant 0 : i32
    %c0_i32_0 = arith.constant 0 : i32
    %c0_i32_1 = arith.constant 0 : i32
    return %arg0, %c0_i32, %c0_i32_0 : i32, i32, i32
  }
}

</mosaic_0001>

<bundles_post_ra>
// kernel: tpu_custom_call.1
= control target key start
LH: loop header
LB: loop body
LE: loop exit
PB: predicated region body
PF: predicated region fallthrough
CT: control target
= control target key end

     0   :  { %8 = vsyncpa [#allocation3], 0  ;;  %s3180_s0 = inlined_call_operand.hbm [shape: f32[32,16,144], index: 0, kind: input, shape index: {}]   ;;  %s3181_s1 = inlined_call_operand.hbm [shape: f32[32,16,144], index: 1, kind: input, shape index: {}]   ;;  %s3182_s2 = inlined_call_operand.hbm [shape: f32[5,5,144], index: 2, kind: input, shape index: {}]   ;;  %s3183_s3 = inlined_call_operand.hbm [shape: f32[14,14,144], index: 3, kind: output, shape index: {}]  }
   0x1   :  { %9 = vsyncpa [#allocation6], 0 }
   0x2   :  { %10 = vsyncpa [#allocation4], 0 }
   0x3   :  { %12 = vsyncpa [#allocation4 + $0x1], 0  ;;  %s2216_s12 = smov 0   ;;  %s2218_s13 = smov 0  }
   0x4   :  { %s2220_s14 = smov 0   ;;  %s2222_s15 = smov 0  }
   0x5 LB: > { %s2237_s16 = sadd.s32 4294967295, %s2186_s15   ;;  %s1679_s17 = sadd.s32 4294967294, %s2186_s15   ;;  %s2186_s15 = sphi %s2222_s15, %s3320_s15   ;;  %s2182_s14 = sphi %s2220_s14, %s3319_s14   ;;  %s2178_s13 = sphi %s2218_s13, %s3318_s13   ;;  %s2174_s12 = sphi %s2216_s12, %s3317_s12  }
   0x6   : > { %s2241_s18 = sadd.s32 1, %s2186_s15   ;;  %s88_s19 = sadd.s32 1, %s2182_s14 }
   0x7   : > { %s85_s20 = ssub.s32 %s2186_s15, %s2241_s18  ;;  %p98_p0 = scmp.ne.s32.totalorder %s2182_s14, %s2178_s13 }
   0x8   : > { %p86_p1 = scmp.eq.s32.totalorder %s85_s20, 0  ;;  %p99_p2 = scmp.eq.s32.totalorder %s2237_s16, 6 }
   0x9   : > { %p104_p3 = scmp.ne.s32.totalorder %s2178_s13, %s2174_s12  ;;  %p105_p4 = scmp.eq.s32.totalorder %s1679_s17, 6 }
   0xa   : > { %s2252_s21 = scalar_select %p86_p1, %s2182_s14, %s88_s19  }
   0xb   : > { %p2254_p5 = por %p99_p2, %p98_p0  ;;  %p2258_p6 = por %p105_p4, %p104_p3 }
   0xc   : > { %p1680_p7 = scmp.ge.s32.totalorder %s2186_s15, 1  ;;  %p112_p8 = scmp.lt.s32.totalorder %s2186_s15, 8 }
   0xd   : > { %s3245_s22 = scalar_select %p2254_p5, 1, 0 }
   0xe   : > { %s3246_s23 = scalar_select %p2258_p6, 1, 0 }
   0xf   : > { %p3184_p9 = scmp.eq.s32.totalorder %s2237_s16, 0  ;;  %p2265_p10 = pnand %p1680_p7, %p112_p8 }
  0x10   : > { %s2188_s25 = smov [#allocation5]   ;;  %s2189_s28 = smov [#allocation2]  }
  0x11   : > { %s3247_s24 = scalar_select %p2265_p10, 1, 0 }
  0x12   : > { %p1972_p11 = pneg %p2265_p10  ;;  %s137_s26 = sshll.u32 %s2188_s25, 4  ;;  %s2271_s26 = int_to_ptr.vmem [resolvable:$true] %s137_s26 }
  0x13   : > { %s124_s29 = sshll.u32 %s2189_s28, 4  ;;  %s2190_s30 = smov [#allocation7]   ;;  %s2279_s29 = int_to_ptr.vmem [resolvable:$true] %s124_s29 }
  0x14   : > { %p2275_p12 = pnand %p3184_p9, %p1972_p11  ;;  %s2281_s4 = sshll.u32 %s2190_s30, 4  ;;  %s151_s4 = int_to_ptr.vmem [resolvable:$true] %s2281_s4 }
  0x15   : > { %s2032_s7 = scalar_lea.hbm %s3181_s1, 16384 }
  0x16   : > { %p2033_p13 = scmp.ne.s32.totalorder %s3181_s1, %s2032_s7  ;;  %p2291_p0 = pneg %p2275_p12 }
  0x17   : > { %p2039_p3 = scmp.lt.u32.totalorder %s2032_s7, %s3181_s1 }
  0x18   : > { %p2035_p1 = pnand %p2291_p0, %p2033_p13 }
  0x1a   : > { %p2036_p2 = pneg %p2035_p1 }
  0x1c   : > { %p2041_p4 = pnand %p2039_p3, %p2036_p2 }
  0x1e   : > { %2044 = shalt.err (!%p2041_p4)
}
  0x1f   : > { %s2045_s19 = scalar_lea.vmem %s2271_s26, 16384  ;;  %p2053_p9 = scmp.lt.s32.totalorder %s2271_s26, %s2271_s26 }
  0x20   : > { %p2046_p7 = scmp.ne.s32.totalorder %s2271_s26, %s2045_s19  ;;  %p2054_p6 = scmp.lt.s32.totalorder %s2045_s19, %s2045_s19 }
  0x22   : > { %p2048_p8 = pnand %p2046_p7, %p2291_p0  ;;  %p2055_p13 = por %p2054_p6, %p2053_p9 }
  0x24   : > { %p2049_p11 = pneg %p2048_p8 }
  0x26   : > { %p2056_p1 = pnand %p2055_p13, %p2049_p11 }
  0x28   : > { %2059 = shalt.err (!%p2056_p1)
}
  0x29   : > { %s2191_s20 = smov 256   ;;  %s2192_s25 = smov 16  }
  0x2a   : > { %1978 = dma.hbm_to_vmem [thread:$0]  (!%p2275_p12), %s3181_s1, 16384, %s2271_s26, [#allocation6], %s2191_s20, %s2191_s20, %s2192_s25  }
  0x2b   : > { %s2060_s7 = scalar_lea.hbm %s3180_s0, 16384 }
  0x2c   : > { %p2061_p6 = scmp.ne.s32.totalorder %s3180_s0, %s2060_s7  ;;  %p2067_p3 = scmp.lt.u32.totalorder %s2060_s7, %s3180_s0 }
  0x2e   : > { %p2063_p9 = pnand %p2061_p6, %p2291_p0 }
  0x30   : > { %p2064_p2 = pneg %p2063_p9 }
  0x32   : > { %p2069_p4 = pnand %p2067_p3, %p2064_p2 }
  0x34   : > { %2072 = shalt.err (!%p2069_p4)
}
  0x35   : > { %s2073_s26 = scalar_lea.vmem %s2279_s29, 16384  ;;  %p2081_p13 = scmp.lt.s32.totalorder %s2279_s29, %s2279_s29 }
  0x36   : > { %p2074_p7 = scmp.ne.s32.totalorder %s2279_s29, %s2073_s26  ;;  %p2082_p1 = scmp.lt.s32.totalorder %s2073_s26, %s2073_s26 }
  0x38   : > { %p2076_p8 = pnand %p2074_p7, %p2291_p0  ;;  %p2083_p6 = por %p2082_p1, %p2081_p13 }
  0x3a   : > { %p2077_p11 = pneg %p2076_p8 }
  0x3c   : > { %p2084_p9 = pnand %p2083_p6, %p2077_p11 }
  0x3e   : > { %2087 = shalt.err (!%p2084_p9)
}
  0x3f   : > { %1975 = dma.hbm_to_vmem [thread:$0]  (!%p2275_p12), %s3180_s0, 16384, %s2279_s29, [#allocation3], %s2191_s20, %s2191_s20, %s2192_s25  }
  0x40   : > { %s2088_s6 = scalar_lea.hbm %s3182_s2, 1280 }
  0x41   : > { %p2089_p2 = scmp.ne.s32.totalorder %s3182_s2, %s2088_s6  ;;  %p2095_p7 = scmp.lt.u32.totalorder %s2088_s6, %s3182_s2 }
  0x43   : > { %p2091_p3 = pnand %p2089_p2, %p2291_p0 }
  0x45   : > { %p2092_p4 = pneg %p2091_p3 }
  0x47   : > { %p2097_p8 = pnand %p2095_p7, %p2092_p4 }
  0x49   : > { %2100 = shalt.err (!%p2097_p8)
}
  0x4a   : > { %s2101_s17 = scalar_lea.vmem %s151_s4, 1280  ;;  %p2109_p6 = scmp.lt.s32.totalorder %s151_s4, %s151_s4 }
  0x4b   : > { %p2102_p11 = scmp.ne.s32.totalorder %s151_s4, %s2101_s17  ;;  %p2110_p9 = scmp.lt.s32.totalorder %s2101_s17, %s2101_s17 }
  0x4d   : > { %p2104_p13 = pnand %p2102_p11, %p2291_p0  ;;  %p2111_p5 = por %p2110_p9, %p2109_p6 }
  0x4f   : > { %p2105_p1 = pneg %p2104_p13 }
  0x51   : > { %p2112_p10 = pnand %p2111_p5, %p2105_p1 }
  0x53   : > { %2115 = shalt.err (!%p2112_p10)
}
  0x54   : > { %1981 = dma.hbm_to_vmem [thread:$0]  (!%p2275_p12), %s3182_s2, 1280, %s151_s4, [#allocation6], %s2191_s20, %s2191_s20, %s2192_s25  }
  0x55   : > { %p3250_p2 = scmp.ne.s32.totalorder %s3247_s24, 0 }
  0x57   : > { %166 = sbr.rel (%p3250_p2) target bundleno = 283 (0x11b), region = 32 }
  0x5e   : > { %p3251_p0 = scmp.eq.s32.totalorder %s2237_s16, 0 }
  0x60   : > { %2161 = dma.done.wait (%p3251_p0), [#allocation3], 16384   ;;  %p3252_p3 = pmov %p3251_p0 }
  0x61   : > { %p3253_p5 = pmov %p3251_p0 }
  0x62   : > { %2163 = vsyncadd (%p3252_p3), [#allocation3], 4294950912 }
  0x63   : > { %2165 = dma.done.wait (%p3253_p5), [#allocation6], 17664   ;;  %p3254_p10 = pmov %p3251_p0 }
  0x64   : > { %v213_v0 = vlaneseq  ;;  %s1928_s27 = sshll.u32 %s2237_s16, 7  ;;  %v195_v7 = vld [vmem:[#allocation7] sm:$0x1f]  ;;  %v196_v8 = vld [vmem:[#allocation7 + $0x8] sm:$0x1f]  ;;  %vm271_vm0 = vcmask 1046528  }
  0x65   : > { %2167 = vsyncadd (%p3254_p10), [#allocation6], 4294949632  ;;  %v2384_v9 = vld [vmem:[#allocation7 + $0x10] sm:$0x1f]  ;;  %v2386_v10 = vld [vmem:[#allocation7 + $0x18] sm:$0x1f] }
  0x66   : > { %v214_v1 = vshrl.u32 %v213_v0, 7  ;;  %s2412_s24 = scalar_lea.vmem [#allocation2], %s1928_s27  ;;  %s2434_s4 = scalar_lea.vmem [#allocation5], %s1928_s27  ;;  %vm340_vm1 = vcmask 1045504   ;;  %vm951_vm2 = vcmask 128000   ;;  %vm948_vm3 = vcmask 130048  }
  0x67   : > { %v209_v19 = vld [vmem:[%s2412_s24] sm:$0xff]  ;;  %v210_v20 = vld [vmem:[%s2412_s24 + $0x8] sm:$0xff]  ;;  %v211_v25 = vld [vmem:[%s2412_s24 + $0x10] sm:$0x3f]  ;;  %s190_s10 = sand.u32 1, %s2178_s13   ;;  %s1957_s19 = sshll.u32 %s2237_s16, 10 }
  0x68   : > { %v2374_v2 = vsub.s32 0, %v214_v1  ;;  %v2376_v3 = vsub.s32 1, %v214_v1  ;;  %v2378_v4 = vsub.s32 2, %v214_v1  ;;  %v2380_v5 = vsub.s32 3, %v214_v1  ;;  %v212_v26 = vld [vmem:[%s2412_s24 + $0x18] sm:$0x3f]  ;;  %s3127_s6 = scalar_lea.hbm %s3183_s3, %s1957_s19 }
  0x69   : > { %v2382_v6 = vsub.s32 4, %v214_v1  ;;  %v231_v29 = vld [vmem:[%s2434_s4] sm:$0xff]  ;;  %v232_v34 = vld [vmem:[%s2434_s4 + $0x8] sm:$0xff]  ;;  %v233_v35 = vld [vmem:[%s2434_s4 + $0x10] sm:$0x3f]  ;;  %s2883_s20 = sshll.u32 %s190_s10, 6 }
  0x6a   : > { %v2389_v11 = vrot.slane %v195_v7, %v2374_v2  ;;  %v2392_v12 = vrot.slane %v196_v8, %v2374_v2  ;;  %v2395_v13 = vrot.slane %v195_v7, %v2376_v3  ;;  %v2398_v14 = vrot.slane %v196_v8, %v2376_v3  ;;  %v234_v36 = vld [vmem:[%s2434_s4 + $0x18] sm:$0x3f]  ;;  %v251_v42 = vld [vmem:[%s2412_s24] sm:$0xfe]  ;;  %v252_v43 = vld [vmem:[%s2412_s24 + $0x8] sm:$0xfe] }
  0x6b   : > { %v2401_v15 = vrot.slane %v195_v7, %v2378_v4  ;;  %v2404_v16 = vrot.slane %v196_v8, %v2378_v4  ;;  %v2407_v17 = vrot.slane %v195_v7, %v2380_v5  ;;  %v2410_v18 = vrot.slane %v196_v8, %v2380_v5  ;;  %v253_v44 = vld [vmem:[%s2412_s24 + $0x10] sm:$0x7f]  ;;  %v254_v47 = vld [vmem:[%s2412_s24 + $0x18] sm:$0x7f]  ;;  %v286_v51 = vld [vmem:[%s2434_s4] sm:$0xfe] }
  0x6c   : > { %v2417_v21 = vrot.slane %v195_v7, %v2382_v6  ;;  %v2420_v22 = vrot.slane %v196_v8, %v2382_v6  ;;  %v2424_v23 = vrot.slane %v2384_v9, %v2374_v2  ;;  %v2428_v24 = vrot.slane %v2386_v10, %v2374_v2  ;;  %v287_v52 = vld [vmem:[%s2434_s4 + $0x8] sm:$0xfe]  ;;  %v288_v57 = vld [vmem:[%s2434_s4 + $0x10] sm:$0x7f]  ;;  %v289_v58 = vld [vmem:[%s2434_s4 + $0x18] sm:$0x7f] }
  0x6d   : > { %v221_v27 = vmul.f32 %v2389_v11, %v209_v19  ;;  %v222_v28 = vmul.f32 %v2392_v12, %v210_v20  ;;  %v2439_v30 = vrot.slane %v2384_v9, %v2376_v3  ;;  %v2443_v31 = vrot.slane %v2386_v10, %v2376_v3  ;;  %v320_v59 = vld [vmem:[%s2412_s24] sm:$0xfc]  ;;  %v321_v19 = vld [vmem:[%s2412_s24 + $0x8] sm:$0xfc]  ;;  %s2906_s25 = scalar_lea.vmem [#allocation8], %s2883_s20  ;;  %s3139_s16 = scalar_lea.sflag [#allocation4], %s190_s10 }
  0x6e   : > { %v223_v32 = vmul.f32 %v2389_v11, %v211_v25  ;;  %v224_v33 = vmul.f32 %v2392_v12, %v212_v26  ;;  %v243_v37 = vmul.f32 %v2395_v13, %v231_v29  ;;  %v2453_v38 = vrot.slane %v2384_v9, %v2378_v4  ;;  %s1514_s28 = sshll.u32 %s2906_s25, 4  ;;  %p3315_p4 = scmp.ne.s32.totalorder %s3245_s22, 0  ;;  %s3129_s28 = int_to_ptr.vmem [resolvable:$true] %s1514_s28 }
  0x6f   : > { %v244_v39 = vmul.f32 %v2398_v14, %v232_v34  ;;  %v245_v40 = vmul.f32 %v2395_v13, %v233_v35  ;;  %v246_v41 = vmul.f32 %v2398_v14, %v234_v36  ;;  %v2463_v45 = vrot.slane %v2386_v10, %v2378_v4  ;;  %s2116_s7 = scalar_lea.vmem %s3129_s28, 1024  ;;  %s2193_s8 = smov [#allocation8]  }
  0x70   : > { %v247_v46 = vadd.f32 %v243_v37, %v221_v27  ;;  %v263_v48 = vmul.f32 %v2401_v15, %v251_v42  ;;  %v264_v49 = vmul.f32 %v2404_v16, %v252_v43  ;;  %v265_v50 = vmul.f32 %v2401_v15, %v253_v44  ;;  %v322_v27 = vld [vmem:[%s2412_s24 + $0x10] sm:$0xff]  ;;  %p2117_p12 = scmp.ne.s32.totalorder %s3129_s28, %s2116_s7  ;;  %s2120_s9 = sshll.u32 %s2193_s8, 4  ;;  %s2121_s9 = int_to_ptr.vmem [resolvable:$false] %s2120_s9 }
  0x71   : > { %v248_v53 = vadd.f32 %v244_v39, %v222_v28  ;;  %v249_v54 = vadd.f32 %v245_v40, %v223_v32  ;;  %v250_v55 = vadd.f32 %v246_v41, %v224_v33  ;;  %v266_v56 = vmul.f32 %v2404_v16, %v254_v47  ;;  %v323_v28 = vld [vmem:[%s2412_s24 + $0x18] sm:$0xff]  ;;  %v1695_v41 = vld [vmem:[%s2412_s24 + $0x20] sm:$0xff]  ;;  %s2122_s11 = scalar_lea.vmem %s2121_s9, 2048  ;;  %p2123_p11 = scmp.lt.s32.totalorder %s3129_s28, %s2121_s9 }
  0x72   : > { %v272_v60 = vrot.slane %v263_v48, 1  ;;  %v273_v61 = vrot.slane %v265_v50, 1  ;;  %v275_v62 = vrot.slane %v264_v49, 1  ;;  %v298_v63 = vmul.f32 %v2407_v17, %v286_v51  ;;  %v1696_v48 = vld [vmem:[%s2412_s24 + $0x28] sm:$0xff]  ;;  %v1697_v49 = vld [vmem:[%s2412_s24 + $0x30] sm:$0x3f]  ;;  %p2118_p7 = pnand %p2117_p12, %p3315_p4  ;;  %p2124_p13 = scmp.lt.s32.totalorder %s2122_s11, %s2116_s7 }
  0x73   : > { %v276_v0 = vrot.slane %v266_v56, 1  ;;  %v299_v1 = vmul.f32 %v2410_v18, %v287_v52  ;;  %v300_v7 = vmul.f32 %v2407_v17, %v288_v57  ;;  %v301_v8 = vmul.f32 %v2410_v18, %v289_v58  ;;  %v1701_v58 = vld [vmem:[%s2434_s4 + $0x20] sm:$0xff] }
  0x74   : > { %v274_v20 = vsel %vm271_vm0, %v272_v60, %v273_v61  ;;  %v284_v25 = vadd.f32 %v273_v61, %v249_v54  ;;  %v306_v26 = vrot.slane %v298_v63, 1  ;;  %v332_v29 = vmul.f32 %v2417_v21, %v320_v59  ;;  %v1702_v59 = vld [vmem:[%s2434_s4 + $0x28] sm:$0xff]  ;;  %p2119_p8 = pneg %p2118_p7  ;;  %p2125_p1 = por %p2124_p13, %p2123_p11 }
  0x75   : > { %v277_v32 = vsel %vm271_vm0, %v275_v62, %v276_v0  ;;  %v282_v33 = vadd.f32 %v274_v20, %v247_v46  ;;  %v285_v34 = vadd.f32 %v276_v0, %v250_v55  ;;  %v307_v35 = vrot.slane %v300_v7, 1  ;;  %v1698_v46 = vld [vmem:[%s2412_s24 + $0x38] sm:$0x3f]  ;;  %v1703_v0 = vld [vmem:[%s2434_s4 + $0x30] sm:$0x3f] }
  0x76   : > { %v283_v36 = vadd.f32 %v277_v32, %v248_v53  ;;  %v309_v37 = vrot.slane %v299_v1, 1  ;;  %v310_v39 = vrot.slane %v301_v8, 1  ;;  %v333_v40 = vmul.f32 %v2420_v22, %v321_v19  ;;  %v1704_v1 = vld [vmem:[%s2434_s4 + $0x38] sm:$0x3f]  ;;  %p2126_p6 = pnand %p2125_p1, %p2119_p8 }
  0x77   : > { %v308_v42 = vsel %vm271_vm0, %v306_v26, %v307_v35  ;;  %v318_v43 = vadd.f32 %v307_v35, %v284_v25  ;;  %v334_v44 = vmul.f32 %v2417_v21, %v322_v27  ;;  %v335_v47 = vmul.f32 %v2420_v22, %v323_v28  ;;  %v1705_v25 = vld [vmem:[%s2412_s24 + $0x20] sm:$0xfe]  ;;  %v1706_v26 = vld [vmem:[%s2412_s24 + $0x28] sm:$0xfe] }
  0x78   : > { %v311_v50 = vsel %vm271_vm0, %v309_v37, %v310_v39  ;;  %v316_v51 = vadd.f32 %v308_v42, %v282_v33  ;;  %v319_v52 = vadd.f32 %v310_v39, %v285_v34  ;;  %v341_v53 = vrot.slane %v332_v29, 2  ;;  %v1707_v33 = vld [vmem:[%s2412_s24 + $0x30] sm:$0x7f]  ;;  %v1708_v34 = vld [vmem:[%s2412_s24 + $0x38] sm:$0x7f] }
  0x79   : > { %v317_v54 = vadd.f32 %v311_v50, %v283_v36  ;;  %v342_v55 = vrot.slane %v334_v44, 2  ;;  %v344_v56 = vrot.slane %v333_v40, 2  ;;  %v345_v57 = vrot.slane %v335_v47, 2  ;;  %v2514_v44 = vld [vmem:[#allocation7 + $0x20] sm:$0x1f] }
  0x7a   : > { %v371_v60 = vmul.f32 %v1695_v41, %v2424_v23  ;;  %v372_v61 = vmul.f32 %v1696_v48, %v2428_v24  ;;  %v373_v62 = vmul.f32 %v1697_v49, %v2424_v23  ;;  %v374_v63 = vmul.f32 %v1698_v46, %v2428_v24  ;;  %v2516_v47 = vld [vmem:[#allocation7 + $0x28] sm:$0x1f] }
  0x7b   : > { %v343_v7 = vsel %vm340_vm1, %v341_v53, %v342_v55  ;;  %v346_v8 = vsel %vm340_vm1, %v344_v56, %v345_v57  ;;  %v353_v19 = vadd.f32 %v342_v55, %v318_v43  ;;  %v354_v20 = vadd.f32 %v345_v57, %v319_v52  ;;  %v1709_v55 = vld [vmem:[%s2434_s4 + $0x20] sm:$0xfe] }
  0x7c   : > { %v351_v27 = vadd.f32 %v343_v7, %v316_v51  ;;  %v352_v28 = vadd.f32 %v346_v8, %v317_v54  ;;  %v393_v29 = vmul.f32 %v1701_v58, %v2439_v30  ;;  %v394_v32 = vmul.f32 %v1702_v59, %v2443_v31  ;;  %v1710_v58 = vld [vmem:[%s2434_s4 + $0x28] sm:$0xfe]  ;;  %v1711_v59 = vld [vmem:[%s2434_s4 + $0x30] sm:$0x7f] }
  0x7d   : > { %v377_v35 = vadd.f32 %v373_v62, %v353_v19  ;;  %v378_v36 = vadd.f32 %v374_v63, %v354_v20  ;;  %v395_v37 = vmul.f32 %v1703_v0, %v2439_v30  ;;  %v396_v39 = vmul.f32 %v1704_v1, %v2443_v31  ;;  %v1712_v62 = vld [vmem:[%s2434_s4 + $0x38] sm:$0x7f]  ;;  %v1713_v63 = vld [vmem:[%s2412_s24 + $0x20] sm:$0xfc]  ;;  %v1714_v0 = vld [vmem:[%s2412_s24 + $0x28] sm:$0xfc] }
  0x7e   : > { %v375_v40 = vadd.f32 %v371_v60, %v351_v27  ;;  %v376_v41 = vadd.f32 %v372_v61, %v352_v28  ;;  %v413_v42 = vmul.f32 %v1705_v25, %v2453_v38  ;;  %v414_v43 = vmul.f32 %v1706_v26, %v2463_v45  ;;  %v1716_v28 = vld [vmem:[%s2412_s24 + $0x38] sm:$0xff] }
  0x7f   : > { %v399_v48 = vadd.f32 %v395_v37, %v377_v35  ;;  %v400_v49 = vadd.f32 %v396_v39, %v378_v36  ;;  %v415_v46 = vmul.f32 %v1707_v33, %v2453_v38  ;;  %v416_v50 = vmul.f32 %v1708_v34, %v2463_v45 }
  0x80   : > { %v397_v51 = vadd.f32 %v393_v29, %v375_v40  ;;  %v398_v52 = vadd.f32 %v394_v32, %v376_v41  ;;  %v421_v53 = vrot.slane %v413_v42, 1  ;;  %v424_v54 = vrot.slane %v414_v43, 1 }
  0x81   : > { %v422_v56 = vrot.slane %v415_v46, 1  ;;  %v425_v57 = vrot.slane %v416_v50, 1  ;;  %v2525_v60 = vrot.slane %v2384_v9, %v2380_v5  ;;  %v2529_v61 = vrot.slane %v2386_v10, %v2380_v5  ;;  %v2563_v50 = vld [vmem:[%s2412_s24 + $0x40] sm:$0xff] }
  0x82   : > { %v2536_v1 = vrot.slane %v2384_v9, %v2382_v6  ;;  %v2540_v7 = vrot.slane %v2386_v10, %v2382_v6  ;;  %v2544_v8 = vrot.slane %v2514_v44, %v2374_v2  ;;  %v2548_v19 = vrot.slane %v2516_v47, %v2374_v2  ;;  %v1715_v9 = vld [vmem:[%s2412_s24 + $0x30] sm:$0xff] }
  0x83   : > { %3255 = vst [vmem:[#allocation12_spill] sm:$0xff] %v2529_v61  ;;  %v423_v20 = vsel %vm271_vm0, %v421_v53, %v422_v56  ;;  %v426_v25 = vsel %vm271_vm0, %v424_v54, %v425_v57  ;;  %v433_v26 = vadd.f32 %v422_v56, %v399_v48  ;;  %v434_v27 = vadd.f32 %v425_v57, %v400_v49  ;;  %v1721_v54 = vld [vmem:[%s2412_s24 + $0x50] sm:$0x3f] }
  0x84   : > { %3256 = vst [vmem:[#allocation13_spill] sm:$0xff] %v2536_v1  ;;  %3257 = vst [vmem:[#allocation14_spill] sm:$0xff] %v2540_v7  ;;  %v431_v29 = vadd.f32 %v423_v20, %v397_v51  ;;  %v432_v10 = vadd.f32 %v426_v25, %v398_v52  ;;  %v447_v32 = vmul.f32 %v1709_v55, %v2525_v60  ;;  %v2566_v51 = vld [vmem:[%s2412_s24 + $0x48] sm:$0xff]  ;;  %v1722_v55 = vld [vmem:[%s2412_s24 + $0x58] sm:$0x3f] }
  0x85   : > { %3258 = vst [vmem:[#allocation15_spill] sm:$0xff] %v2544_v8  ;;  %3259 = vst [vmem:[#allocation16_spill] sm:$0xff] %v2548_v19  ;;  %v448_v33 = vmul.f32 %v1710_v58, %v2529_v61  ;;  %v449_v34 = vmul.f32 %v1711_v59, %v2525_v60  ;;  %v450_v35 = vmul.f32 %v1712_v62, %v2529_v61 }
  0x86   : > { %v481_v36 = vmul.f32 %v1713_v63, %v2536_v1  ;;  %v482_v37 = vmul.f32 %v1714_v0, %v2540_v7  ;;  %v455_v39 = vrot.slane %v447_v32, 1  ;;  %v483_v41 = vmul.f32 %v1715_v9, %v2536_v1  ;;  %v1759_v1 = vld [vmem:[%s2434_s4 + $0x70] sm:$0x7f] }
  0x87   : > { %v458_v40 = vrot.slane %v448_v33, 1  ;;  %v484_v42 = vmul.f32 %v1716_v28, %v2540_v7  ;;  %v456_v43 = vrot.slane %v449_v34, 1  ;;  %v459_v48 = vrot.slane %v450_v35, 1  ;;  %v2581_v35 = vld [vmem:[%s2434_s4 + $0x40] sm:$0xff]  ;;  %v1758_v7 = vld [vmem:[%s2434_s4 + $0x68] sm:$0xfe] }
  0x88   : > { %v489_v49 = vrot.slane %v481_v36, 2  ;;  %v492_v46 = vrot.slane %v482_v37, 2  ;;  %v490_v52 = vrot.slane %v483_v41, 2  ;;  %v519_v56 = vmul.f32 %v2563_v50, %v2544_v8  ;;  %v1728_v36 = vld [vmem:[%s2434_s4 + $0x58] sm:$0x3f] }
  0x89   : > { %v493_v53 = vrot.slane %v484_v42, 2  ;;  %v520_v57 = vmul.f32 %v2566_v51, %v2548_v19  ;;  %v457_v58 = vsel %vm271_vm0, %v455_v39, %v456_v43  ;;  %v460_v59 = vsel %vm271_vm0, %v458_v40, %v459_v48  ;;  %v1729_v39 = vld [vmem:[%s2412_s24 + $0x40] sm:$0xfe]  ;;  %v1730_v40 = vld [vmem:[%s2412_s24 + $0x48] sm:$0xfe] }
  0x8a   : > { %v467_v62 = vadd.f32 %v456_v43, %v433_v26  ;;  %v468_v63 = vadd.f32 %v459_v48, %v434_v27  ;;  %v465_v0 = vadd.f32 %v457_v58, %v431_v29  ;;  %v466_v20 = vadd.f32 %v460_v59, %v432_v10  ;;  %v1727_v26 = vld [vmem:[%s2434_s4 + $0x50] sm:$0x3f]  ;;  %v2596_v43 = vld [vmem:[%s2434_s4 + $0x48] sm:$0xff] }
  0x8b   : > { %v491_v25 = vsel %vm340_vm1, %v489_v49, %v490_v52  ;;  %v494_v9 = vsel %vm340_vm1, %v492_v46, %v493_v53  ;;  %v521_v33 = vmul.f32 %v1721_v54, %v2544_v8  ;;  %v522_v34 = vmul.f32 %v1722_v55, %v2548_v19  ;;  %v1731_v48 = vld [vmem:[%s2412_s24 + $0x50] sm:$0x7f]  ;;  %v1732_v49 = vld [vmem:[%s2412_s24 + $0x58] sm:$0x7f] }
  0x8c   : > { %v501_v28 = vadd.f32 %v490_v52, %v467_v62  ;;  %v502_v32 = vadd.f32 %v493_v53, %v468_v63  ;;  %v499_v27 = vadd.f32 %v491_v25, %v465_v0  ;;  %v500_v29 = vadd.f32 %v494_v9, %v466_v20  ;;  %v2616_v20 = vld [vmem:[#allocation7 + $0x30] sm:$0x1f] }
  0x8d   : > { %v2587_v10 = vrot.slane %v2514_v44, %v2376_v3  ;;  %v2591_v37 = vrot.slane %v2516_v47, %v2376_v3  ;;  %v2602_v46 = vrot.slane %v2514_v44, %v2378_v4  ;;  %v2606_v52 = vrot.slane %v2516_v47, %v2378_v4 }
  0x8e   : > { %v525_v41 = vadd.f32 %v521_v33, %v501_v28  ;;  %v526_v42 = vadd.f32 %v522_v34, %v502_v32  ;;  %v523_v53 = vadd.f32 %v519_v56, %v499_v27  ;;  %v524_v54 = vadd.f32 %v520_v57, %v500_v29  ;;  %v2618_v56 = vld [vmem:[#allocation7 + $0x38] sm:$0x1f]  ;;  %v1733_v27 = vld [vmem:[%s2434_s4 + $0x40] sm:$0xfe] }
  0x8f   : > { %3260 = vst [vmem:[#allocation17_spill] sm:$0xff] %v2587_v10  ;;  %3261 = vst [vmem:[#allocation18_spill] sm:$0xff] %v2591_v37  ;;  %v541_v55 = vmul.f32 %v2581_v35, %v2587_v10  ;;  %v542_v58 = vmul.f32 %v2596_v43, %v2591_v37  ;;  %v543_v59 = vmul.f32 %v1727_v26, %v2587_v10  ;;  %v2659_v10 = vld [vmem:[%s2412_s24 + $0x50] sm:$0xff] }
  0x90   : > { %3262 = vst [vmem:[#allocation19_spill] sm:$0xff] %v2602_v46  ;;  %3263 = vst [vmem:[#allocation20_spill] sm:$0xff] %v2606_v52  ;;  %v544_v62 = vmul.f32 %v1728_v36, %v2591_v37  ;;  %v561_v63 = vmul.f32 %v1729_v39, %v2602_v46  ;;  %v562_v0 = vmul.f32 %v1730_v40, %v2606_v52  ;;  %v1734_v39 = vld [vmem:[%s2434_s4 + $0x48] sm:$0xfe]  ;;  %v1735_v40 = vld [vmem:[%s2434_s4 + $0x50] sm:$0x7f] }
  0x91   : > { %v545_v57 = vadd.f32 %v541_v55, %v523_v53  ;;  %v546_v25 = vadd.f32 %v542_v58, %v524_v54  ;;  %v563_v9 = vmul.f32 %v1731_v48, %v2602_v46  ;;  %v564_v28 = vmul.f32 %v1732_v49, %v2606_v52  ;;  %v1736_v48 = vld [vmem:[%s2434_s4 + $0x58] sm:$0x7f]  ;;  %v1737_v54 = vld [vmem:[%s2412_s24 + $0x40] sm:$0xfc] }
  0x92   : > { %v547_v32 = vadd.f32 %v543_v59, %v525_v41  ;;  %v548_v33 = vadd.f32 %v544_v62, %v526_v42  ;;  %v569_v34 = vrot.slane %v561_v63, 1  ;;  %v572_v26 = vrot.slane %v562_v0, 1  ;;  %v1738_v41 = vld [vmem:[%s2412_s24 + $0x48] sm:$0xfc] }
  0x93   : > { %v570_v29 = vrot.slane %v563_v9, 1  ;;  %v573_v36 = vrot.slane %v564_v28, 1  ;;  %v2627_v37 = vrot.slane %v2514_v44, %v2380_v5  ;;  %v2631_v53 = vrot.slane %v2516_v47, %v2380_v5 }
  0x94   : > { %v2638_v42 = vrot.slane %v2514_v44, %v2382_v6  ;;  %v2642_v49 = vrot.slane %v2516_v47, %v2382_v6  ;;  %v2646_v55 = vrot.slane %v2616_v20, %v2374_v2  ;;  %v2650_v58 = vrot.slane %v2618_v56, %v2374_v2 }
  0x95   : > { %3264 = vst [vmem:[#allocation21_spill] sm:$0xff] %v2627_v37  ;;  %3265 = vst [vmem:[#allocation22_spill] sm:$0xff] %v2631_v53  ;;  %v571_v59 = vsel %vm271_vm0, %v569_v34, %v570_v29  ;;  %v574_v62 = vsel %vm271_vm0, %v572_v26, %v573_v36  ;;  %v581_v63 = vadd.f32 %v570_v29, %v547_v32  ;;  %v2662_v34 = vld [vmem:[%s2412_s24 + $0x58] sm:$0xff] }
  0x96   : > { %3266 = vst [vmem:[#allocation23_spill] sm:$0xff] %v2638_v42  ;;  %3267 = vst [vmem:[#allocation24_spill] sm:$0xff] %v2642_v49  ;;  %v582_v0 = vadd.f32 %v573_v36, %v548_v33  ;;  %v579_v44 = vadd.f32 %v571_v59, %v545_v57  ;;  %v580_v9 = vadd.f32 %v574_v62, %v546_v25  ;;  %v2674_v59 = vld [vmem:[%s2412_s24 + $0x68] sm:$0xff] }
  0x97   : > { %3268 = vst [vmem:[#allocation25_spill] sm:$0xff] %v2646_v55  ;;  %3269 = vst [vmem:[#allocation26_spill] sm:$0xff] %v2650_v58  ;;  %v595_v28 = vmul.f32 %v1733_v27, %v2627_v37  ;;  %v596_v47 = vmul.f32 %v1734_v39, %v2631_v53  ;;  %v597_v52 = vmul.f32 %v1735_v40, %v2627_v37 }
  0x98   : > { %v598_v46 = vmul.f32 %v1736_v48, %v2631_v53  ;;  %v629_v32 = vmul.f32 %v1737_v54, %v2638_v42  ;;  %v630_v57 = vmul.f32 %v1738_v41, %v2642_v49  ;;  %v631_v26 = vmul.f32 %v2659_v10, %v2638_v42  ;;  %v2671_v48 = vld [vmem:[%s2412_s24 + $0x60] sm:$0xff]  ;;  %v1745_v53 = vld [vmem:[%s2412_s24 + $0x70] sm:$0x3f]  ;;  %v1746_v41 = vld [vmem:[%s2412_s24 + $0x78] sm:$0x3f] }
  0x99   : > { %v603_v25 = vrot.slane %v595_v28, 1  ;;  %v606_v33 = vrot.slane %v596_v47, 1  ;;  %v632_v27 = vmul.f32 %v2662_v34, %v2642_v49  ;;  %v604_v29 = vrot.slane %v597_v52, 1 }
  0x9a   : > { %v607_v36 = vrot.slane %v598_v46, 1  ;;  %v637_v39 = vrot.slane %v629_v32, 2  ;;  %v640_v40 = vrot.slane %v630_v57, 2  ;;  %v638_v62 = vrot.slane %v631_v26, 2 }
  0x9b   : > { %v641_v54 = vrot.slane %v632_v27, 2  ;;  %v667_v28 = vmul.f32 %v2671_v48, %v2646_v55  ;;  %v668_v47 = vmul.f32 %v2674_v59, %v2650_v58  ;;  %v605_v46 = vsel %vm271_vm0, %v603_v25, %v604_v29 }
  0x9c   : > { %v608_v52 = vsel %vm271_vm0, %v606_v33, %v607_v36  ;;  %v615_v32 = vadd.f32 %v604_v29, %v581_v63  ;;  %v616_v57 = vadd.f32 %v607_v36, %v582_v0  ;;  %v613_v26 = vadd.f32 %v605_v46, %v579_v44  ;;  %v2689_v33 = vld [vmem:[%s2434_s4 + $0x60] sm:$0xff]  ;;  %v1751_v63 = vld [vmem:[%s2434_s4 + $0x70] sm:$0x3f]  ;;  %v1752_v29 = vld [vmem:[%s2434_s4 + $0x78] sm:$0x3f] }
  0x9d   : > { %v614_v27 = vadd.f32 %v608_v52, %v580_v9  ;;  %v639_v49 = vsel %vm340_vm1, %v637_v39, %v638_v62  ;;  %v642_v42 = vsel %vm340_vm1, %v640_v40, %v641_v54  ;;  %v669_v25 = vmul.f32 %v1745_v53, %v2646_v55  ;;  %v1753_v39 = vld [vmem:[%s2412_s24 + $0x60] sm:$0xfe]  ;;  %v1754_v40 = vld [vmem:[%s2412_s24 + $0x68] sm:$0xfe]  ;;  %v1756_v46 = vld [vmem:[%s2412_s24 + $0x78] sm:$0x7f] }
  0x9e   : > { %v649_v37 = vadd.f32 %v638_v62, %v615_v32  ;;  %v650_v19 = vadd.f32 %v641_v54, %v616_v57  ;;  %v670_v8 = vmul.f32 %v1746_v41, %v2650_v58  ;;  %v647_v0 = vadd.f32 %v639_v49, %v613_v26  ;;  %v2704_v54 = vld [vmem:[%s2434_s4 + $0x68] sm:$0xff]  ;;  %v1755_v41 = vld [vmem:[%s2412_s24 + $0x70] sm:$0x7f]  ;;  %v1757_v58 = vld [vmem:[%s2434_s4 + $0x60] sm:$0xfe] }
  0x9f   : > { %v648_v44 = vadd.f32 %v642_v42, %v614_v27  ;;  %v2695_v9 = vrot.slane %v2616_v20, %v2376_v3  ;;  %v2699_v36 = vrot.slane %v2618_v56, %v2376_v3  ;;  %v2710_v42 = vrot.slane %v2616_v20, %v2378_v4 }
  0xa0   : > { %v673_v62 = vadd.f32 %v669_v25, %v649_v37  ;;  %v674_v53 = vadd.f32 %v670_v8, %v650_v19  ;;  %v2714_v49 = vrot.slane %v2618_v56, %v2378_v4  ;;  %v671_v52 = vadd.f32 %v667_v28, %v647_v0  ;;  %v2724_v25 = vld [vmem:[#allocation7 + $0x40] sm:$0x1f]  ;;  %v2726_v28 = vld [vmem:[#allocation7 + $0x48] sm:$0x1f] }
  0xa1   : > { %3270 = vst [vmem:[#allocation27_spill] sm:$0xff] %v2695_v9  ;;  %3271 = vst [vmem:[#allocation28_spill] sm:$0xff] %v2699_v36  ;;  %v672_v32 = vadd.f32 %v668_v47, %v648_v44  ;;  %v689_v57 = vmul.f32 %v2689_v33, %v2695_v9  ;;  %v690_v8 = vmul.f32 %v2704_v54, %v2699_v36 }
  0xa2   : > { %3272 = vst [vmem:[#allocation29_spill] sm:$0xff] %v2710_v42  ;;  %3273 = vst [vmem:[#allocation30_spill] sm:$0xff] %v2714_v49  ;;  %v691_v19 = vmul.f32 %v1751_v63, %v2695_v9  ;;  %v692_v37 = vmul.f32 %v1752_v29, %v2699_v36  ;;  %v709_v26 = vmul.f32 %v1753_v39, %v2710_v42 }
  0xa3   : > { %v710_v27 = vmul.f32 %v1754_v40, %v2714_v49  ;;  %v693_v47 = vadd.f32 %v689_v57, %v671_v52  ;;  %v694_v0 = vadd.f32 %v690_v8, %v672_v32  ;;  %v711_v44 = vmul.f32 %v1755_v41, %v2710_v42  ;;  %v1760_v41 = vld [vmem:[%s2434_s4 + $0x78] sm:$0x7f]  ;;  %v1761_v32 = vld [vmem:[%s2412_s24 + $0x60] sm:$0xfc] }
  0xa4   : > { %v712_v63 = vmul.f32 %v1756_v46, %v2714_v49  ;;  %v695_v29 = vadd.f32 %v691_v19, %v673_v62  ;;  %v696_v36 = vadd.f32 %v692_v37, %v674_v53  ;;  %v717_v9 = vrot.slane %v709_v26, 1  ;;  %v1762_v62 = vld [vmem:[%s2412_s24 + $0x68] sm:$0xfc] }
  0xa5   : > { %v720_v39 = vrot.slane %v710_v27, 1  ;;  %v718_v55 = vrot.slane %v711_v44, 1  ;;  %v2735_v61 = vrot.slane %v2616_v20, %v2380_v5  ;;  %v2739_v52 = vrot.slane %v2618_v56, %v2380_v5 }
  0xa6   : > { %v721_v40 = vrot.slane %v712_v63, 1  ;;  %v2746_v53 = vrot.slane %v2616_v20, %v2382_v6  ;;  %v2750_v46 = vrot.slane %v2618_v56, %v2382_v6  ;;  %v2754_v57 = vrot.slane %v2724_v25, %v2374_v2 }
  0xa7   : > { %3274 = vst [vmem:[#allocation31_spill] sm:$0xff] %v2735_v61  ;;  %3275 = vst [vmem:[#allocation32_spill] sm:$0xff] %v2739_v52  ;;  %v2758_v8 = vrot.slane %v2726_v28, %v2374_v2  ;;  %v719_v19 = vsel %vm271_vm0, %v717_v9, %v718_v55  ;;  %v729_v26 = vadd.f32 %v718_v55, %v695_v29  ;;  %v2767_v2 = vld [vmem:[%s2412_s24 + $0x70] sm:$0xff]  ;;  %v2770_v9 = vld [vmem:[%s2412_s24 + $0x78] sm:$0xff] }
  0xa8   : > { %3276 = vst [vmem:[#allocation33_spill] sm:$0xff] %v2746_v53  ;;  %3277 = vst [vmem:[#allocation34_spill] sm:$0xff] %v2750_v46  ;;  %v722_v37 = vsel %vm271_vm0, %v720_v39, %v721_v40  ;;  %v730_v27 = vadd.f32 %v721_v40, %v696_v36  ;;  %v727_v20 = vadd.f32 %v719_v19, %v693_v47  ;;  %v2782_v19 = vld [vmem:[%s2412_s24 + $0x88] sm:$0xff] }
  0xa9   : > { %3278 = vst [vmem:[#allocation35_spill] sm:$0xff] %v2758_v8  ;;  %v728_v44 = vadd.f32 %v722_v37, %v694_v0  ;;  %v743_v63 = vmul.f32 %v1757_v58, %v2735_v61  ;;  %v744_v56 = vmul.f32 %v1758_v7, %v2739_v52  ;;  %v745_v49 = vmul.f32 %v1759_v1, %v2735_v61 }
  0xaa   : > { %v746_v42 = vmul.f32 %v1760_v41, %v2739_v52  ;;  %v777_v55 = vmul.f32 %v1761_v32, %v2746_v53  ;;  %v778_v36 = vmul.f32 %v1762_v62, %v2750_v46  ;;  %v779_v7 = vmul.f32 %v2767_v2, %v2746_v53  ;;  %v2779_v41 = vld [vmem:[%s2412_s24 + $0x80] sm:$0xff]  ;;  %3280 = vst [vmem:[#allocation37_spill] sm:$0xff] %v2782_v19  ;;  %v1769_v52 = vld [vmem:[%s2412_s24 + $0x90] sm:$0x3f]  ;;  %v1770_v62 = vld [vmem:[%s2412_s24 + $0x98] sm:$0x3f] }
  0xab   : > { %v751_v47 = vrot.slane %v743_v63, 1  ;;  %v754_v58 = vrot.slane %v744_v56, 1  ;;  %v780_v1 = vmul.f32 %v2770_v9, %v2750_v46  ;;  %v752_v0 = vrot.slane %v745_v49, 1  ;;  %3279 = vst [vmem:[#allocation36_spill] sm:$0xff] %v2779_v41 }
  0xac   : > { %v755_v29 = vrot.slane %v746_v42, 1  ;;  %v785_v39 = vrot.slane %v777_v55, 2  ;;  %v788_v40 = vrot.slane %v778_v36, 2  ;;  %v786_v37 = vrot.slane %v779_v7, 2 }
  0xad   : > { %v789_v32 = vrot.slane %v780_v1, 2  ;;  %v815_v63 = vmul.f32 %v2779_v41, %v2754_v57  ;;  %v816_v56 = vmul.f32 %v2782_v19, %v2758_v8  ;;  %v753_v42 = vsel %vm271_vm0, %v751_v47, %v752_v0 }
  0xae   : > { %v756_v49 = vsel %vm271_vm0, %v754_v58, %v755_v29  ;;  %v763_v55 = vadd.f32 %v752_v0, %v729_v26  ;;  %v764_v36 = vadd.f32 %v755_v29, %v730_v27  ;;  %v761_v7 = vadd.f32 %v753_v42, %v727_v20  ;;  %v2797_v58 = vld [vmem:[%s2434_s4 + $0x80] sm:$0xff]  ;;  %v1775_v26 = vld [vmem:[%s2434_s4 + $0x90] sm:$0x3f]  ;;  %v1776_v0 = vld [vmem:[%s2434_s4 + $0x98] sm:$0x3f] }
  0xaf   : > { %v762_v1 = vadd.f32 %v756_v49, %v728_v44  ;;  %v787_v46 = vsel %vm340_vm1, %v785_v39, %v786_v37  ;;  %v790_v53 = vsel %vm340_vm1, %v788_v40, %v789_v32  ;;  %v817_v47 = vmul.f32 %v1769_v52, %v2754_v57  ;;  %v1777_v39 = vld [vmem:[%s2412_s24 + $0x80] sm:$0xfe]  ;;  %v1778_v40 = vld [vmem:[%s2412_s24 + $0x88] sm:$0xfe]  ;;  %v1780_v42 = vld [vmem:[%s2412_s24 + $0x98] sm:$0x7f] }
  0xb0   : > { %v797_v61 = vadd.f32 %v786_v37, %v763_v55  ;;  %v798_v41 = vadd.f32 %v789_v32, %v764_v36  ;;  %v818_v19 = vmul.f32 %v1770_v62, %v2758_v8  ;;  %v795_v27 = vadd.f32 %v787_v46, %v761_v7  ;;  %v2812_v32 = vld [vmem:[%s2434_s4 + $0x88] sm:$0xff]  ;;  %v1779_v62 = vld [vmem:[%s2412_s24 + $0x90] sm:$0x7f] }
  0xb1   : > { %v796_v20 = vadd.f32 %v790_v53, %v762_v1  ;;  %v2803_v44 = vrot.slane %v2724_v25, %v2376_v3  ;;  %v2807_v29 = vrot.slane %v2726_v28, %v2376_v3  ;;  %v2818_v53 = vrot.slane %v2724_v25, %v2378_v4 }
  0xb2   : > { %v821_v37 = vadd.f32 %v817_v47, %v797_v61  ;;  %v822_v52 = vadd.f32 %v818_v19, %v798_v41  ;;  %v2822_v46 = vrot.slane %v2726_v28, %v2378_v4  ;;  %v819_v49 = vadd.f32 %v815_v63, %v795_v27 }
  0xb3   : > { %3281 = vst [vmem:[#allocation38_spill] sm:$0xff] %v2803_v44  ;;  %3282 = vst [vmem:[#allocation39_spill] sm:$0xff] %v2807_v29  ;;  %v820_v3 = vadd.f32 %v816_v56, %v796_v20  ;;  %v837_v55 = vmul.f32 %v2797_v58, %v2803_v44  ;;  %v838_v61 = vmul.f32 %v2812_v32, %v2807_v29 }
  0xb4   : > { %v839_v41 = vmul.f32 %v1775_v26, %v2803_v44  ;;  %v840_v19 = vmul.f32 %v1776_v0, %v2807_v29  ;;  %v857_v36 = vmul.f32 %v1777_v39, %v2818_v53  ;;  %v858_v4 = vmul.f32 %v1778_v40, %v2822_v46  ;;  %v1781_v44 = vld [vmem:[%s2434_s4 + $0x80] sm:$0xfe]  ;;  %v1782_v29 = vld [vmem:[%s2434_s4 + $0x88] sm:$0xfe]  ;;  %v1783_v39 = vld [vmem:[%s2434_s4 + $0x90] sm:$0x7f] }
  0xb5   : > { %v841_v63 = vadd.f32 %v837_v55, %v819_v49  ;;  %v842_v56 = vadd.f32 %v838_v61, %v820_v3  ;;  %v859_v7 = vmul.f32 %v1779_v62, %v2818_v53  ;;  %v860_v1 = vmul.f32 %v1780_v42, %v2822_v46  ;;  %v1784_v62 = vld [vmem:[%s2434_s4 + $0x98] sm:$0x7f]  ;;  %v1785_v42 = vld [vmem:[%s2412_s24 + $0x80] sm:$0xfc] }
  0xb6   : > { %v843_v47 = vadd.f32 %v839_v41, %v821_v37  ;;  %v844_v27 = vadd.f32 %v840_v19, %v822_v52  ;;  %v865_v20 = vrot.slane %v857_v36, 1  ;;  %v868_v26 = vrot.slane %v858_v4, 1  ;;  %v1786_v37 = vld [vmem:[%s2412_s24 + $0x88] sm:$0xfc]  ;;  %v2866_v4 = vld [vmem:[%s2412_s24 + $0x90] sm:$0xff] }
  0xb7   : > { %v866_v8 = vrot.slane %v859_v7, 1  ;;  %v869_v0 = vrot.slane %v860_v1, 1  ;;  %v2839_v40 = vrot.slane %v2724_v25, %v2380_v5  ;;  %v2843_v49 = vrot.slane %v2726_v28, %v2380_v5  ;;  %v2871_v1 = vld [vmem:[%s2412_s24 + $0x98] sm:$0xff] }
  0xb8   : > { %v2850_v52 = vrot.slane %v2724_v25, %v2382_v6  ;;  %v2854_v3 = vrot.slane %v2726_v28, %v2382_v6  ;;  %v962_v55 = vmul.f32 %v2563_v50, %v2389_v11  ;;  %v963_v5 = vmul.f32 %v2566_v51, %v2392_v12 }
  0xb9   : > { %v867_v61 = vsel %vm271_vm0, %v865_v20, %v866_v8  ;;  %v870_v41 = vsel %vm271_vm0, %v868_v26, %v869_v0  ;;  %v877_v25 = vadd.f32 %v866_v8, %v843_v47  ;;  %v878_v19 = vadd.f32 %v869_v0, %v844_v27  ;;  %v1793_v27 = vld [vmem:[%s2412_s24 + $0x50] sm:$0x3f] }
  0xba   : > { %3283 = vst [vmem:[#allocation40_spill] sm:$0xff] %v2850_v52  ;;  %3284 = vst [vmem:[#allocation41_spill] sm:$0xff] %v2854_v3  ;;  %v875_v6 = vadd.f32 %v867_v61, %v841_v63  ;;  %v876_v28 = vadd.f32 %v870_v41, %v842_v56  ;;  %v891_v36 = vmul.f32 %v1781_v44, %v2839_v40  ;;  %v1794_v63 = vld [vmem:[%s2412_s24 + $0x58] sm:$0x3f] }
  0xbb   : > { %v892_v50 = vmul.f32 %v1782_v29, %v2843_v49  ;;  %v893_v51 = vmul.f32 %v1783_v39, %v2839_v40  ;;  %v894_v7 = vmul.f32 %v1784_v62, %v2843_v49  ;;  %v925_v8 = vmul.f32 %v1785_v42, %v2850_v52 }
  0xbc   : > { %v926_v47 = vmul.f32 %v1786_v37, %v2854_v3  ;;  %v899_v20 = vrot.slane %v891_v36, 1  ;;  %v927_v44 = vmul.f32 %v2866_v4, %v2850_v52  ;;  %v928_v29 = vmul.f32 %v2871_v1, %v2854_v3 }
  0xbd   : > { %v902_v56 = vrot.slane %v892_v50, 1  ;;  %v900_v26 = vrot.slane %v893_v51, 1  ;;  %v903_v0 = vrot.slane %v894_v7, 1  ;;  %v933_v39 = vrot.slane %v925_v8, 2  ;;  %v1799_v51 = vld [vmem:[%s2434_s4 + $0x50] sm:$0x3f] }
  0xbe   : > { %v936_v62 = vrot.slane %v926_v47, 2  ;;  %v934_v42 = vrot.slane %v927_v44, 2  ;;  %v937_v37 = vrot.slane %v928_v29, 2  ;;  %v964_v61 = vmul.f32 %v1793_v27, %v2389_v11  ;;  %v1800_v7 = vld [vmem:[%s2434_s4 + $0x58] sm:$0x3f] }
  0xbf   : > { %v965_v41 = vmul.f32 %v1794_v63, %v2392_v12  ;;  %v901_v36 = vsel %vm271_vm0, %v899_v20, %v900_v26  ;;  %v904_v50 = vsel %vm271_vm0, %v902_v56, %v903_v0  ;;  %v911_v3 = vadd.f32 %v900_v26, %v877_v25  ;;  %v1801_v12 = vld [vmem:[%s2412_s24 + $0x40] sm:$0xfe]  ;;  %v1802_v27 = vld [vmem:[%s2412_s24 + $0x48] sm:$0xfe] }
  0xc0   : > { %v912_v52 = vadd.f32 %v903_v0, %v878_v19  ;;  %v909_v8 = vadd.f32 %v901_v36, %v875_v6  ;;  %v910_v47 = vadd.f32 %v904_v50, %v876_v28  ;;  %v935_v44 = vsel %vm340_vm1, %v933_v39, %v934_v42  ;;  %v1803_v19 = vld [vmem:[%s2412_s24 + $0x50] sm:$0x7f]  ;;  %v1804_v6 = vld [vmem:[%s2412_s24 + $0x58] sm:$0x7f]  ;;  %v1805_v39 = vld [vmem:[%s2434_s4 + $0x40] sm:$0xfe] }
  0xc1   : > { %v938_v11 = vsel %vm340_vm1, %v936_v62, %v937_v37  ;;  %v945_v63 = vadd.f32 %v934_v42, %v911_v3  ;;  %v976_v56 = vmul.f32 %v2581_v35, %v2395_v13  ;;  %v977_v25 = vmul.f32 %v2596_v43, %v2398_v14  ;;  %v1806_v62 = vld [vmem:[%s2434_s4 + $0x48] sm:$0xfe]  ;;  %v1808_v3 = vld [vmem:[%s2434_s4 + $0x58] sm:$0x7f] }
  0xc2   : > { %v946_v20 = vadd.f32 %v937_v37, %v912_v52  ;;  %v943_v28 = vadd.f32 %v935_v44, %v909_v8  ;;  %v944_v29 = vadd.f32 %v938_v11, %v910_v47  ;;  %v978_v26 = vmul.f32 %v1799_v51, %v2395_v13  ;;  %v1809_v51 = vld [vmem:[%s2412_s24 + $0x40] sm:$0xfc] }
  0xc3   : > { %v979_v0 = vmul.f32 %v1800_v7, %v2398_v14  ;;  %950 = vst [vmem:[%s2906_s25 + $0x10] sm:$0x3f] %v945_v63  ;;  %v980_v35 = vadd.f32 %v976_v56, %v962_v55  ;;  %v981_v43 = vadd.f32 %v977_v25, %v963_v5  ;;  %v988_v52 = vmul.f32 %v1801_v12, %v2401_v15  ;;  %v1807_v14 = vld [vmem:[%s2434_s4 + $0x50] sm:$0x7f]  ;;  %v1810_v7 = vld [vmem:[%s2412_s24 + $0x48] sm:$0xfc] }
  0xc4   : > { %952 = vst.msk [vmem:[%s2906_s25 + $0x18] sm:$0x3f] %vm951_vm2, %v946_v20  ;;  %v989_v13 = vmul.f32 %v1802_v27, %v2404_v16  ;;  %947 = vst [vmem:[%s2906_s25] sm:$0xff] %v943_v28  ;;  %v982_v42 = vadd.f32 %v978_v26, %v964_v61  ;;  %v990_v36 = vmul.f32 %v1803_v19, %v2401_v15 }
  0xc5   : > { %949 = vst.msk [vmem:[%s2906_s25 + $0x8] sm:$0xff] %vm948_vm3, %v944_v29  ;;  %v983_v37 = vadd.f32 %v979_v0, %v965_v41  ;;  %v991_v50 = vmul.f32 %v1804_v6, %v2404_v16  ;;  %v996_v8 = vrot.slane %v988_v52, 1  ;;  %v1014_v5 = vmul.f32 %v1805_v39, %v2407_v17  ;;  %v1818_v39 = vld [vmem:[%s2412_s24 + $0x70] sm:$0x3f] }
  0xc6   : > { %v999_v55 = vrot.slane %v989_v13, 1  ;;  %v1015_v47 = vmul.f32 %v1806_v62, %v2410_v18  ;;  %v997_v44 = vrot.slane %v990_v36, 1  ;;  %v1016_v12 = vmul.f32 %v1807_v14, %v2407_v17  ;;  %v1819_v62 = vld [vmem:[%s2412_s24 + $0x78] sm:$0x3f]  ;;  %v1825_v36 = vld [vmem:[%s2434_s4 + $0x70] sm:$0x3f] }
  0xc7   : > { %v1000_v11 = vrot.slane %v991_v50, 1  ;;  %v1017_v27 = vmul.f32 %v1808_v3, %v2410_v18  ;;  %v1022_v61 = vrot.slane %v1014_v5, 1  ;;  %v1040_v15 = vmul.f32 %v1809_v51, %v2417_v21  ;;  %v1826_v50 = vld [vmem:[%s2434_s4 + $0x78] sm:$0x3f]  ;;  %v1827_v5 = vld [vmem:[%s2412_s24 + $0x60] sm:$0xfe] }
  0xc8   : > { %v1025_v41 = vrot.slane %v1015_v47, 1  ;;  %v1041_v16 = vmul.f32 %v1810_v7, %v2420_v22  ;;  %v998_v63 = vsel %vm271_vm0, %v996_v8, %v997_v44  ;;  %v1008_v56 = vadd.f32 %v997_v44, %v982_v42  ;;  %v1829_v44 = vld [vmem:[%s2412_s24 + $0x70] sm:$0x7f] }
  0xc9   : > { %v1001_v20 = vsel %vm271_vm0, %v999_v55, %v1000_v11  ;;  %v1009_v25 = vadd.f32 %v1000_v11, %v983_v37  ;;  %v1006_v19 = vadd.f32 %v998_v63, %v980_v35  ;;  %v1023_v28 = vrot.slane %v1016_v12, 1  ;;  %v1830_v11 = vld [vmem:[%s2412_s24 + $0x78] sm:$0x7f] }
  0xca   : > { %v1007_v6 = vadd.f32 %v1001_v20, %v981_v43  ;;  %v1026_v17 = vrot.slane %v1017_v27, 1  ;;  %v1042_v18 = vmul.f32 %v2659_v10, %v2417_v21  ;;  %v1043_v29 = vmul.f32 %v2662_v34, %v2420_v22  ;;  %v1831_v20 = vld [vmem:[%s2434_s4 + $0x60] sm:$0xfe] }
  0xcb   : > { %v1048_v26 = vrot.slane %v1040_v15, 2  ;;  %v1051_v0 = vrot.slane %v1041_v16, 2  ;;  %v1024_v52 = vsel %vm271_vm0, %v1022_v61, %v1023_v28  ;;  %v1034_v35 = vadd.f32 %v1023_v28, %v1008_v56  ;;  %v1832_v56 = vld [vmem:[%s2434_s4 + $0x68] sm:$0xfe] }
  0xcc   : > { %v1027_v13 = vsel %vm271_vm0, %v1025_v41, %v1026_v17  ;;  %v1035_v43 = vadd.f32 %v1026_v17, %v1009_v25  ;;  %v1032_v14 = vadd.f32 %v1024_v52, %v1006_v19  ;;  %v1049_v21 = vrot.slane %v1042_v18, 2  ;;  %v1834_v17 = vld [vmem:[%s2434_s4 + $0x78] sm:$0x7f]  ;;  %v1835_v18 = vld [vmem:[%s2412_s24 + $0x60] sm:$0xfc] }
  0xcd   : > { %v1033_v3 = vadd.f32 %v1027_v13, %v1007_v6  ;;  %v1052_v10 = vrot.slane %v1043_v29, 2  ;;  %v1070_v22 = vmul.f32 %v2671_v48, %v2424_v23  ;;  %v1071_v34 = vmul.f32 %v2674_v59, %v2428_v24  ;;  %v1828_v48 = vld [vmem:[%s2412_s24 + $0x68] sm:$0xfe]  ;;  %v3285_v13 = vld [vmem:[#allocation12_spill] sm:$0xff] }
  0xce   : > { %v1072_v42 = vmul.f32 %v1818_v39, %v2424_v23  ;;  %v1073_v37 = vmul.f32 %v1819_v62, %v2428_v24  ;;  %v1050_v51 = vsel %vm340_vm1, %v1048_v26, %v1049_v21  ;;  %v1060_v8 = vadd.f32 %v1049_v21, %v1034_v35 }
  0xcf   : > { %v1053_v7 = vsel %vm340_vm1, %v1051_v0, %v1052_v10  ;;  %v1061_v55 = vadd.f32 %v1052_v10, %v1035_v43  ;;  %v1058_v47 = vadd.f32 %v1050_v51, %v1032_v14  ;;  %v1084_v23 = vmul.f32 %v2689_v33, %v2439_v30 }
  0xd0   : > { %v1059_v59 = vadd.f32 %v1053_v7, %v1033_v3  ;;  %v1085_v24 = vmul.f32 %v2704_v54, %v2443_v31  ;;  %v1076_v12 = vadd.f32 %v1072_v42, %v1060_v8  ;;  %v1086_v61 = vmul.f32 %v1825_v36, %v2439_v30  ;;  %v1833_v54 = vld [vmem:[%s2434_s4 + $0x70] sm:$0x7f]  ;;  %v1836_v30 = vld [vmem:[%s2412_s24 + $0x68] sm:$0xfc] }
  0xd1   : > { %v1077_v27 = vadd.f32 %v1073_v37, %v1061_v55  ;;  %v1087_v41 = vmul.f32 %v1826_v50, %v2443_v31  ;;  %v1074_v15 = vadd.f32 %v1070_v22, %v1058_v47  ;;  %v1096_v63 = vmul.f32 %v1827_v5, %v2453_v38 }
  0xd2   : > { %v1075_v16 = vadd.f32 %v1071_v34, %v1059_v59  ;;  %v1097_v33 = vmul.f32 %v1828_v48, %v2463_v45  ;;  %v1090_v25 = vadd.f32 %v1086_v61, %v1076_v12  ;;  %v1098_v6 = vmul.f32 %v1829_v44, %v2453_v38  ;;  %v3286_v38 = vld [vmem:[#allocation13_spill] sm:$0xff] }
  0xd3   : > { %v1091_v19 = vadd.f32 %v1087_v41, %v1077_v27  ;;  %v1099_v28 = vmul.f32 %v1830_v11, %v2463_v45  ;;  %v1088_v29 = vadd.f32 %v1084_v23, %v1074_v15  ;;  %v1104_v26 = vrot.slane %v1096_v63, 1  ;;  %v3287_v45 = vld [vmem:[#allocation14_spill] sm:$0xff]  ;;  %v1844_v23 = vld [vmem:[%s2412_s24 + $0x90] sm:$0x3f]  ;;  %v3288_v41 = vld [vmem:[#allocation15_spill] sm:$0xff] }
  0xd4   : > { %v1089_v31 = vadd.f32 %v1085_v24, %v1075_v16  ;;  %v1107_v0 = vrot.slane %v1097_v33, 1  ;;  %v1105_v39 = vrot.slane %v1098_v6, 1  ;;  %v1122_v52 = vmul.f32 %v1831_v20, %v2525_v60  ;;  %v1845_v24 = vld [vmem:[%s2412_s24 + $0x98] sm:$0x3f]  ;;  %v3290_v16 = vld [vmem:[#allocation16_spill] sm:$0xff] }
  0xd5   : > { %v1108_v62 = vrot.slane %v1099_v28, 1  ;;  %v1123_v35 = vmul.f32 %v1832_v56, %v3285_v13  ;;  %v1124_v43 = vmul.f32 %v1833_v54, %v2525_v60  ;;  %v1125_v14 = vmul.f32 %v1834_v17, %v3285_v13  ;;  %v3291_v63 = vld [vmem:[#allocation37_spill] sm:$0xff]  ;;  %v1851_v20 = vld [vmem:[%s2434_s4 + $0x90] sm:$0x3f]  ;;  %v1853_v28 = vld [vmem:[%s2412_s24 + $0x80] sm:$0xfe] }
  0xd6   : > { %v1148_v3 = vmul.f32 %v1835_v18, %v3286_v38  ;;  %v1149_v21 = vmul.f32 %v1836_v30, %v3287_v45  ;;  %v1106_v10 = vsel %vm271_vm0, %v1104_v26, %v1105_v39  ;;  %v1116_v34 = vadd.f32 %v1105_v39, %v1090_v25  ;;  %v1852_v6 = vld [vmem:[%s2434_s4 + $0x98] sm:$0x3f]  ;;  %v1854_v26 = vld [vmem:[%s2412_s24 + $0x88] sm:$0xfe] }
  0xd7   : > { %v1109_v22 = vsel %vm271_vm0, %v1107_v0, %v1108_v62  ;;  %v1117_v42 = vadd.f32 %v1108_v62, %v1091_v19  ;;  %v1114_v37 = vadd.f32 %v1106_v10, %v1088_v29  ;;  %v1130_v50 = vrot.slane %v1122_v52, 1  ;;  %v3292_v29 = vld [vmem:[#allocation17_spill] sm:$0xff]  ;;  %v1855_v0 = vld [vmem:[%s2412_s24 + $0x90] sm:$0x7f]  ;;  %v3293_v52 = vld [vmem:[#allocation18_spill] sm:$0xff] }
  0xd8   : > { %v1115_v36 = vadd.f32 %v1109_v22, %v1089_v31  ;;  %v1131_v51 = vrot.slane %v1124_v43, 1  ;;  %v1133_v7 = vrot.slane %v1123_v35, 1  ;;  %v1134_v60 = vrot.slane %v1125_v14, 1  ;;  %v1856_v43 = vld [vmem:[%s2412_s24 + $0x98] sm:$0x7f] }
  0xd9   : > { %v1150_v8 = vmul.f32 %v2767_v2, %v3286_v38  ;;  %v1151_v55 = vmul.f32 %v2770_v9, %v3287_v45  ;;  %v1156_v47 = vrot.slane %v1148_v3, 2  ;;  %v1159_v59 = vrot.slane %v1149_v21, 2  ;;  %v3289_v9 = vld [vmem:[#allocation36_spill] sm:$0xff]  ;;  %v3294_v45 = vld [vmem:[#allocation19_spill] sm:$0xff]  ;;  %v1857_v21 = vld [vmem:[%s2434_s4 + $0x80] sm:$0xfe] }
  0xda   : > { %v1132_v5 = vsel %vm271_vm0, %v1130_v50, %v1131_v51  ;;  %v1142_v48 = vadd.f32 %v1131_v51, %v1116_v34  ;;  %v1135_v44 = vsel %vm271_vm0, %v1133_v7, %v1134_v60  ;;  %v1143_v12 = vadd.f32 %v1134_v60, %v1117_v42  ;;  %v3295_v34 = vld [vmem:[#allocation20_spill] sm:$0xff]  ;;  %v1860_v50 = vld [vmem:[%s2434_s4 + $0x98] sm:$0x7f] }
  0xdb   : > { %v1140_v11 = vadd.f32 %v1132_v5, %v1114_v37  ;;  %v1157_v27 = vrot.slane %v1150_v8, 2  ;;  %v1141_v2 = vadd.f32 %v1135_v44, %v1115_v36  ;;  %v1160_v61 = vrot.slane %v1151_v55, 2  ;;  %v1858_v36 = vld [vmem:[%s2434_s4 + $0x88] sm:$0xfe]  ;;  %v1861_v55 = vld [vmem:[%s2412_s24 + $0x80] sm:$0xfc] }
  0xdc   : > { %v1178_v15 = vmul.f32 %v3289_v9, %v3288_v41  ;;  %v1179_v33 = vmul.f32 %v3291_v63, %v3290_v16  ;;  %v1180_v25 = vmul.f32 %v1844_v23, %v3288_v41  ;;  %v1181_v19 = vmul.f32 %v1845_v24, %v3290_v16  ;;  %v3297_v44 = vld [vmem:[#allocation22_spill] sm:$0xff] }
  0xdd   : > { %v1158_v56 = vsel %vm340_vm1, %v1156_v47, %v1157_v27  ;;  %v1168_v54 = vadd.f32 %v1157_v27, %v1142_v48  ;;  %v1161_v17 = vsel %vm340_vm1, %v1159_v59, %v1160_v61  ;;  %v1169_v30 = vadd.f32 %v1160_v61, %v1143_v12  ;;  %v3296_v59 = vld [vmem:[#allocation21_spill] sm:$0xff] }
  0xde   : > { %v1166_v18 = vadd.f32 %v1158_v56, %v1140_v11  ;;  %v1192_v31 = vmul.f32 %v2797_v58, %v3292_v29  ;;  %v1167_v39 = vadd.f32 %v1161_v17, %v1141_v2  ;;  %v1193_v13 = vmul.f32 %v2812_v32, %v3293_v52  ;;  %v1859_v32 = vld [vmem:[%s2434_s4 + $0x90] sm:$0x7f]  ;;  %v1862_v2 = vld [vmem:[%s2412_s24 + $0x88] sm:$0xfc]  ;;  %v1868_v17 = vld [vmem:[%s2412_s24 + $0xa0] sm:$0xff] }
  0xdf   : > { %v1184_v62 = vadd.f32 %v1180_v25, %v1168_v54  ;;  %v1194_v35 = vmul.f32 %v1851_v20, %v3292_v29  ;;  %v1185_v38 = vadd.f32 %v1181_v19, %v1169_v30  ;;  %v1195_v3 = vmul.f32 %v1852_v6, %v3293_v52  ;;  %v3299_v6 = vld [vmem:[#allocation24_spill] sm:$0xff] }
  0xe0   : > { %v1182_v14 = vadd.f32 %v1178_v15, %v1166_v18  ;;  %v1204_v58 = vmul.f32 %v1853_v28, %v3294_v45  ;;  %v1183_v10 = vadd.f32 %v1179_v33, %v1167_v39  ;;  %v1205_v42 = vmul.f32 %v1854_v26, %v3295_v34  ;;  %v3298_v15 = vld [vmem:[#allocation23_spill] sm:$0xff]  ;;  %v1871_v39 = vld [vmem:[%s2412_s24 + $0xb8] sm:$0x3f] }
  0xe1   : > { %v1198_v22 = vadd.f32 %v1194_v35, %v1184_v62  ;;  %v1206_v37 = vmul.f32 %v1855_v0, %v3294_v45  ;;  %v1199_v7 = vadd.f32 %v1195_v3, %v1185_v38  ;;  %v1207_v60 = vmul.f32 %v1856_v43, %v3295_v34  ;;  %v1869_v26 = vld [vmem:[%s2412_s24 + $0xa8] sm:$0xff]  ;;  %v1870_v0 = vld [vmem:[%s2412_s24 + $0xb0] sm:$0x3f] }
  0xe2   : > { %v1196_v51 = vadd.f32 %v1192_v31, %v1182_v14  ;;  %v1212_v8 = vrot.slane %v1204_v58, 1  ;;  %v1197_v5 = vadd.f32 %v1193_v13, %v1183_v10  ;;  %v1215_v47 = vrot.slane %v1205_v42, 1  ;;  %v1876_v45 = vld [vmem:[%s2434_s4 + $0xa8] sm:$0xff]  ;;  %v3300_v58 = vld [vmem:[#allocation25_spill] sm:$0xff]  ;;  %v1877_v42 = vld [vmem:[%s2434_s4 + $0xb0] sm:$0x3f] }
  0xe3   : > { %v1213_v48 = vrot.slane %v1206_v37, 1  ;;  %v1230_v23 = vmul.f32 %v1857_v21, %v3296_v59  ;;  %v1216_v24 = vrot.slane %v1207_v60, 1  ;;  %v1231_v11 = vmul.f32 %v1858_v36, %v3297_v44  ;;  %v3301_v21 = vld [vmem:[#allocation26_spill] sm:$0xff]  ;;  %v1878_v37 = vld [vmem:[%s2434_s4 + $0xb8] sm:$0x3f] }
  0xe4   : > { %v1232_v12 = vmul.f32 %v1859_v32, %v3296_v59  ;;  %v1233_v27 = vmul.f32 %v1860_v50, %v3297_v44  ;;  %v1256_v16 = vmul.f32 %v1861_v55, %v3298_v15  ;;  %v1257_v28 = vmul.f32 %v1862_v2, %v3299_v6  ;;  %v1880_v60 = vld [vmem:[%s2412_s24 + $0xa8] sm:$0xfe] }
  0xe5   : > { %v1214_v61 = vsel %vm271_vm0, %v1212_v8, %v1213_v48  ;;  %v1224_v41 = vadd.f32 %v1213_v48, %v1198_v22  ;;  %v1238_v9 = vrot.slane %v1230_v23, 1  ;;  %v1217_v63 = vsel %vm271_vm0, %v1215_v47, %v1216_v24  ;;  %v3303_v47 = vld [vmem:[#allocation28_spill] sm:$0xff] }
  0xe6   : > { %v1222_v33 = vadd.f32 %v1214_v61, %v1196_v51  ;;  %v1225_v20 = vadd.f32 %v1216_v24, %v1199_v7  ;;  %v1239_v56 = vrot.slane %v1232_v12, 1  ;;  %v1223_v54 = vadd.f32 %v1217_v63, %v1197_v5  ;;  %v1879_v7 = vld [vmem:[%s2412_s24 + $0xa0] sm:$0xfe]  ;;  %v3302_v5 = vld [vmem:[#allocation27_spill] sm:$0xff]  ;;  %v1881_v23 = vld [vmem:[%s2412_s24 + $0xb0] sm:$0x7f] }
  0xe7   : > { %v1241_v25 = vrot.slane %v1231_v11, 1  ;;  %v1242_v19 = vrot.slane %v1233_v27, 1  ;;  %v1258_v29 = vmul.f32 %v2866_v4, %v3298_v15  ;;  %v1259_v31 = vmul.f32 %v2871_v1, %v3299_v6  ;;  %v1875_v4 = vld [vmem:[%s2434_s4 + $0xa0] sm:$0xff]  ;;  %v1882_v24 = vld [vmem:[%s2412_s24 + $0xb8] sm:$0x7f] }
  0xe8   : > { %v1240_v18 = vsel %vm271_vm0, %v1238_v9, %v1239_v56  ;;  %v1250_v30 = vadd.f32 %v1239_v56, %v1224_v41  ;;  %v1264_v35 = vrot.slane %v1256_v16, 2  ;;  %v1267_v38 = vrot.slane %v1257_v28, 2  ;;  %v3304_v41 = vld [vmem:[#allocation29_spill] sm:$0xff]  ;;  %v3305_v15 = vld [vmem:[#allocation30_spill] sm:$0xff] }
  0xe9   : > { %v1243_v62 = vsel %vm271_vm0, %v1241_v25, %v1242_v19  ;;  %v1248_v52 = vadd.f32 %v1240_v18, %v1222_v33  ;;  %v1251_v13 = vadd.f32 %v1242_v19, %v1225_v20  ;;  %v1265_v14 = vrot.slane %v1258_v29, 2  ;;  %v1883_v63 = vld [vmem:[%s2434_s4 + $0xa0] sm:$0xfe]  ;;  %v1884_v33 = vld [vmem:[%s2434_s4 + $0xa8] sm:$0xfe] }
  0xea   : > { %v1249_v43 = vadd.f32 %v1243_v62, %v1223_v54  ;;  %v1268_v3 = vrot.slane %v1259_v31, 2  ;;  %v1286_v1 = vmul.f32 %v1868_v17, %v3300_v58  ;;  %v1287_v10 = vmul.f32 %v1869_v26, %v3301_v21  ;;  %v1885_v20 = vld [vmem:[%s2434_s4 + $0xb0] sm:$0x7f]  ;;  %v1886_v6 = vld [vmem:[%s2434_s4 + $0xb8] sm:$0x7f] }
  0xeb   : > { %v1288_v22 = vmul.f32 %v1870_v0, %v3300_v58  ;;  %v1289_v34 = vmul.f32 %v1871_v39, %v3301_v21  ;;  %v1266_v36 = vsel %vm340_vm1, %v1264_v35, %v1265_v14  ;;  %v1276_v50 = vadd.f32 %v1265_v14, %v1250_v30  ;;  %v1887_v28 = vld [vmem:[%s2412_s24 + $0xa0] sm:$0xfc]  ;;  %v1888_v17 = vld [vmem:[%s2412_s24 + $0xa8] sm:$0xfc]  ;;  %v1889_v14 = vld [vmem:[%s2412_s24 + $0xb0] sm:$0xff] }
  0xec   : > { %v1269_v32 = vsel %vm340_vm1, %v1267_v38, %v1268_v3  ;;  %v1277_v51 = vadd.f32 %v1268_v3, %v1251_v13  ;;  %v1274_v8 = vadd.f32 %v1266_v36, %v1248_v52  ;;  %v1300_v48 = vmul.f32 %v1875_v4, %v3302_v5  ;;  %v3306_v39 = vld [vmem:[#allocation31_spill] sm:$0xff]  ;;  %v3307_v52 = vld [vmem:[#allocation32_spill] sm:$0xff]  ;;  %v1890_v38 = vld [vmem:[%s2412_s24 + $0xb8] sm:$0xff] }
  0xed   : > { %v1275_v55 = vadd.f32 %v1269_v32, %v1249_v43  ;;  %v1301_v59 = vmul.f32 %v1876_v45, %v3303_v47  ;;  %v1292_v44 = vadd.f32 %v1288_v22, %v1276_v50  ;;  %v1302_v12 = vmul.f32 %v1877_v42, %v3302_v5  ;;  %v3308_v3 = vld [vmem:[#allocation33_spill] sm:$0xff]  ;;  %v3309_v45 = vld [vmem:[#allocation34_spill] sm:$0xff] }
  0xee   : > { %v1293_v11 = vadd.f32 %v1289_v34, %v1277_v51  ;;  %v1303_v27 = vmul.f32 %v1878_v37, %v3303_v47  ;;  %v1290_v2 = vadd.f32 %v1286_v1, %v1274_v8  ;;  %v1312_v9 = vmul.f32 %v1879_v7, %v3304_v41  ;;  %v1895_v8 = vld [vmem:[%s2412_s24 + $0xc8] sm:$0xff] }
  0xef   : > { %v1291_v61 = vadd.f32 %v1287_v10, %v1275_v55  ;;  %v1313_v16 = vmul.f32 %v1880_v60, %v3305_v15  ;;  %v1306_v56 = vadd.f32 %v1302_v12, %v1292_v44  ;;  %v1314_v25 = vmul.f32 %v1881_v23, %v3304_v41  ;;  %v1894_v60 = vld [vmem:[%s2412_s24 + $0xc0] sm:$0xff]  ;;  %v1897_v23 = vld [vmem:[%s2412_s24 + $0xd8] sm:$0x3f] }
  0xf0   : > { %v1307_v54 = vadd.f32 %v1303_v27, %v1293_v11  ;;  %v1315_v19 = vmul.f32 %v1882_v24, %v3305_v15  ;;  %v1304_v18 = vadd.f32 %v1300_v48, %v1290_v2  ;;  %v1320_v29 = vrot.slane %v1312_v9, 1  ;;  %v1901_v27 = vld [vmem:[%s2434_s4 + $0xc0] sm:$0xff]  ;;  %v3310_v9 = vld [vmem:[#allocation35_spill] sm:$0xff] }
  0xf1   : > { %v1305_v30 = vadd.f32 %v1301_v59, %v1291_v61  ;;  %v1323_v31 = vrot.slane %v1313_v16, 1  ;;  %v1321_v26 = vrot.slane %v1314_v25, 1  ;;  %v1338_v62 = vmul.f32 %v1883_v63, %v3306_v39  ;;  %v1896_v59 = vld [vmem:[%s2412_s24 + $0xd0] sm:$0x3f]  ;;  %v1902_v16 = vld [vmem:[%s2434_s4 + $0xc8] sm:$0xff] }
  0xf2   : > { %v1324_v0 = vrot.slane %v1315_v19, 1  ;;  %v1339_v13 = vmul.f32 %v1884_v33, %v3307_v52  ;;  %v1340_v35 = vmul.f32 %v1885_v20, %v3306_v39  ;;  %v1341_v43 = vmul.f32 %v1886_v6, %v3307_v52  ;;  %v1903_v63 = vld [vmem:[%s2434_s4 + $0xd0] sm:$0x3f]  ;;  %v1904_v25 = vld [vmem:[%s2434_s4 + $0xd8] sm:$0x3f]  ;;  %v3312_v39 = vld [vmem:[#allocation39_spill] sm:$0xff] }
  0xf3   : > { %v1364_v4 = vmul.f32 %v1887_v28, %v3308_v3  ;;  %v1365_v58 = vmul.f32 %v1888_v17, %v3309_v45  ;;  %v1322_v1 = vsel %vm271_vm0, %v1320_v29, %v1321_v26  ;;  %v1332_v10 = vadd.f32 %v1321_v26, %v1306_v56  ;;  %v1905_v19 = vld [vmem:[%s2412_s24 + $0xc0] sm:$0xfe]  ;;  %v1906_v29 = vld [vmem:[%s2412_s24 + $0xc8] sm:$0xfe]  ;;  %v1908_v52 = vld [vmem:[%s2412_s24 + $0xd8] sm:$0x7f] }
  0xf4   : > { %v1325_v21 = vsel %vm271_vm0, %v1323_v31, %v1324_v0  ;;  %v1333_v22 = vadd.f32 %v1324_v0, %v1307_v54  ;;  %v1330_v34 = vadd.f32 %v1322_v1, %v1304_v18  ;;  %v1346_v37 = vrot.slane %v1338_v62, 1  ;;  %v3311_v18 = vld [vmem:[#allocation38_spill] sm:$0xff]  ;;  %v1907_v31 = vld [vmem:[%s2412_s24 + $0xd0] sm:$0x7f]  ;;  %v1910_v1 = vld [vmem:[%s2434_s4 + $0xc8] sm:$0xfe] }
  0xf5   : > { %v1331_v42 = vadd.f32 %v1325_v21, %v1305_v30  ;;  %v1347_v36 = vrot.slane %v1340_v35, 1  ;;  %v1349_v32 = vrot.slane %v1339_v13, 1  ;;  %v1350_v50 = vrot.slane %v1341_v43, 1  ;;  %v1911_v21 = vld [vmem:[%s2434_s4 + $0xd0] sm:$0x7f] }
  0xf6   : > { %v1366_v51 = vmul.f32 %v1889_v14, %v3308_v3  ;;  %v1367_v7 = vmul.f32 %v1890_v38, %v3309_v45  ;;  %v1372_v48 = vrot.slane %v1364_v4, 2  ;;  %v1375_v47 = vrot.slane %v1365_v58, 2  ;;  %v1909_v38 = vld [vmem:[%s2434_s4 + $0xc0] sm:$0xfe] }
  0xf7   : > { %v1348_v55 = vsel %vm271_vm0, %v1346_v37, %v1347_v36  ;;  %v1358_v5 = vadd.f32 %v1347_v36, %v1332_v10  ;;  %v1351_v24 = vsel %vm271_vm0, %v1349_v32, %v1350_v50  ;;  %v1359_v11 = vadd.f32 %v1350_v50, %v1333_v22  ;;  %v1912_v10 = vld [vmem:[%s2434_s4 + $0xd8] sm:$0x7f]  ;;  %v1913_v36 = vld [vmem:[%s2412_s24 + $0xc0] sm:$0xfc] }
  0xf8   : > { %v1356_v44 = vadd.f32 %v1348_v55, %v1330_v34  ;;  %v1373_v12 = vrot.slane %v1366_v51, 2  ;;  %v1357_v2 = vadd.f32 %v1351_v24, %v1331_v42  ;;  %v1376_v61 = vrot.slane %v1367_v7, 2  ;;  %v3313_v24 = vld [vmem:[#allocation40_spill] sm:$0xff] }
  0xf9   : > { %v1394_v41 = vmul.f32 %v1894_v60, %v2754_v57  ;;  %v1395_v15 = vmul.f32 %v1895_v8, %v3310_v9  ;;  %v1396_v56 = vmul.f32 %v1896_v59, %v2754_v57  ;;  %v1397_v54 = vmul.f32 %v1897_v23, %v3310_v9  ;;  %v1915_v59 = vld [vmem:[%s2412_s24 + $0xd0] sm:$0xff]  ;;  %v1916_v23 = vld [vmem:[%s2412_s24 + $0xd8] sm:$0xff] }
  0xfa   : > { %v1374_v33 = vsel %vm340_vm1, %v1372_v48, %v1373_v12  ;;  %v1384_v20 = vadd.f32 %v1373_v12, %v1358_v5  ;;  %v1377_v6 = vsel %vm340_vm1, %v1375_v47, %v1376_v61  ;;  %v1385_v17 = vadd.f32 %v1376_v61, %v1359_v11  ;;  %v1914_v5 = vld [vmem:[%s2412_s24 + $0xc8] sm:$0xfc] }
  0xfb   : > { %v1382_v28 = vadd.f32 %v1374_v33, %v1356_v44  ;;  %v1408_v30 = vmul.f32 %v1901_v27, %v3311_v18  ;;  %v1383_v26 = vadd.f32 %v1377_v6, %v1357_v2  ;;  %v1409_v57 = vmul.f32 %v1902_v16, %v3312_v39 }
  0xfc   : > { %v1400_v0 = vadd.f32 %v1396_v56, %v1384_v20  ;;  %v1410_v62 = vmul.f32 %v1903_v63, %v3311_v18  ;;  %v1401_v35 = vadd.f32 %v1397_v54, %v1385_v17  ;;  %v1411_v43 = vmul.f32 %v1904_v25, %v3312_v39 }
  0xfd   : > { %v1398_v13 = vadd.f32 %v1394_v41, %v1382_v28  ;;  %v1420_v14 = vmul.f32 %v1905_v19, %v2818_v53  ;;  %v1399_v3 = vadd.f32 %v1395_v15, %v1383_v26  ;;  %v1421_v45 = vmul.f32 %v1906_v29, %v2822_v46 }
  0xfe   : > { %v1414_v4 = vadd.f32 %v1410_v62, %v1400_v0  ;;  %v1422_v58 = vmul.f32 %v1907_v31, %v2818_v53  ;;  %v1415_v34 = vadd.f32 %v1411_v43, %v1401_v35  ;;  %v1423_v42 = vmul.f32 %v1908_v52, %v2822_v46 }
  0xff   : > { %v1412_v22 = vadd.f32 %v1408_v30, %v1398_v13  ;;  %v1428_v37 = vrot.slane %v1420_v14, 1  ;;  %v1413_v32 = vadd.f32 %v1409_v57, %v1399_v3  ;;  %v1431_v51 = vrot.slane %v1421_v45, 1 }
 0x100   : > { %v1429_v50 = vrot.slane %v1422_v58, 1  ;;  %v1446_v7 = vmul.f32 %v1909_v38, %v2839_v40  ;;  %v1432_v60 = vrot.slane %v1423_v42, 1  ;;  %v1447_v53 = vmul.f32 %v1910_v1, %v2843_v49 }
 0x101   : > { %v1448_v8 = vmul.f32 %v1911_v21, %v2839_v40  ;;  %v1449_v55 = vmul.f32 %v1912_v10, %v2843_v49  ;;  %v1472_v44 = vmul.f32 %v1913_v36, %v3313_v24  ;;  %v3314_v49 = vld [vmem:[#allocation41_spill] sm:$0xff]  ;;  %v1474_v63 = vmul.f32 %v1915_v59, %v3313_v24 }
 0x102   : > { %v1430_v48 = vsel %vm271_vm0, %v1428_v37, %v1429_v50  ;;  %v1440_v47 = vadd.f32 %v1429_v50, %v1414_v4  ;;  %v1454_v46 = vrot.slane %v1446_v7, 1  ;;  %v1433_v11 = vsel %vm271_vm0, %v1431_v51, %v1432_v60 }
 0x103   : > { %v1438_v12 = vadd.f32 %v1430_v48, %v1412_v22  ;;  %v1441_v27 = vadd.f32 %v1432_v60, %v1415_v34  ;;  %v1455_v2 = vrot.slane %v1448_v8, 1  ;;  %v1439_v61 = vadd.f32 %v1433_v11, %v1413_v32 }
 0x104   : > { %v1457_v40 = vrot.slane %v1447_v53, 1  ;;  %v1458_v41 = vrot.slane %v1449_v55, 1  ;;  %v1473_v9 = vmul.f32 %v1914_v5, %v3314_v49  ;;  %v1475_v33 = vmul.f32 %v1916_v23, %v3314_v49 }
 0x105   : > { %v1456_v15 = vsel %vm271_vm0, %v1454_v46, %v1455_v2  ;;  %v1466_v16 = vadd.f32 %v1455_v2, %v1440_v47  ;;  %v1480_v25 = vrot.slane %v1472_v44, 2  ;;  %v1481_v6 = vrot.slane %v1474_v63, 2 }
 0x106   : > { %v1459_v20 = vsel %vm271_vm0, %v1457_v40, %v1458_v41  ;;  %v1464_v56 = vadd.f32 %v1456_v15, %v1438_v12  ;;  %v1467_v54 = vadd.f32 %v1458_v41, %v1441_v27  ;;  %v1483_v28 = vrot.slane %v1473_v9, 2 }
 0x107   : > { %v1465_v19 = vadd.f32 %v1459_v20, %v1439_v61  ;;  %v1484_v17 = vrot.slane %v1475_v33, 2  ;;  %v1482_v18 = vsel %vm340_vm1, %v1480_v25, %v1481_v6  ;;  %v1492_v29 = vadd.f32 %v1481_v6, %v1466_v16 }
 0x108   : > { %v1490_v26 = vadd.f32 %v1482_v18, %v1464_v56 }
 0x109   : > { %v1485_v30 = vsel %vm340_vm1, %v1483_v28, %v1484_v17  ;;  %v1493_v31 = vadd.f32 %v1484_v17, %v1467_v54  ;;  %1919 = vst [vmem:[%s2906_s25 + $0x30] sm:$0x3f] %v1492_v29 }
 0x10a   : > { %v1491_v0 = vadd.f32 %v1485_v30, %v1465_v19  ;;  %1917 = vst [vmem:[%s2906_s25 + $0x20] sm:$0xff] %v1490_v26 }
 0x10b   : > { %1920 = vst.msk [vmem:[%s2906_s25 + $0x38] sm:$0x3f] %vm951_vm2, %v1493_v31 }
 0x10c   : > { %1918 = vst.msk [vmem:[%s2906_s25 + $0x28] sm:$0xff] %vm948_vm3, %v1491_v0 }
 0x10d   : > { %2129 = shalt.err (!%p2126_p6)
}
 0x10e   : > { %s2130_s17 = scalar_lea.hbm %s3127_s6, 1024  ;;  %s2134_s27 = scalar_lea.hbm %s3183_s3, 7168 }
 0x10f   : > { %p2131_p9 = scmp.ne.s32.totalorder %s3127_s6, %s2130_s17  ;;  %p2135_p3 = scmp.lt.u32.totalorder %s3127_s6, %s3183_s3 }
 0x110   : > { %p2136_p5 = scmp.lt.u32.totalorder %s2134_s27, %s2130_s17  ;;  %p2138_p12 = scmp.lt.u32.totalorder %s2130_s17, %s3127_s6 }
 0x111   : > { %p2132_p2 = pnand %p2131_p9, %p3315_p4 }
 0x112   : > { %p2137_p10 = por %p2136_p5, %p2135_p3 }
 0x113   : > { %p2133_p0 = pneg %p2132_p2 }
 0x114   : > { %p2139_p7 = por %p2138_p12, %p2137_p10 }
 0x116   : > { %p2140_p8 = pnand %p2139_p7, %p2133_p0 }
 0x118   : > { %2143 = shalt.err (!%p2140_p8)
}
 0x119   : > { %s2194_s10 = smov 256   ;;  %s2195_s20 = smov 16  }
 0x11a   : > { %1970 = dma.vmem_to_hbm [thread:$0]  (%p3315_p4), %s3129_s28, 1024, %s3127_s6, %s3139_s16, %s2194_s10, %s2194_s10, %s2195_s20  }
 0x11b PF: > { %p1992_p11 = scmp.ge.s32.totalorder %s2186_s15, 2  ;;  %s1529_s25 = sand.u32 1, %s2174_s12  }
 0x11c   : > { %p3316_p13 = scmp.ne.s32.totalorder %s3246_s23, 0  ;;  %s1530_s19 = scalar_lea.sflag [#allocation4], %s1529_s25 }
 0x11e   : > { %p1983_p1 = pnand %p1992_p11, %p3316_p13 }
 0x120   : > { %2169 = dma.done.wait (!%p1983_p1), %s1530_s19, 1024  }
 0x121   : > { %2171 = vsyncadd (!%p1983_p1), %s1530_s19, 4294966272  ;;  %p15_p6 = scmp.ge.s32.totalorder %s2241_s18, 9   ;;  %s3317_s12 = smov %s2178_s13 }
 0x122   : > { %s3318_s13 = smov %s2182_s14  ;;  %s3319_s14 = smov %s2252_s21 }
 0x123   : > { %s3320_s15 = smov %s2241_s18  ;;  %17 = sbr.rel (!%p15_p6) target bundleno = 5 (0x5), region = 98 }
 0x12a   :  { %1535 = vsyncpa [#allocation3], 1 }
 0x12b   :  { %1537 = vsyncpa [#allocation3 + $0x1], 1 }
 0x12c   :  { %1538 = vsyncpa [#allocation6], 1 }
 0x12d   :  { %1539 = vsyncpa [#allocation4], 1 }
 0x12e   :  { %1541 = vsyncpa [#allocation4 + $0x1], 1 }

</bundles_post_ra>
